<compile_context>
chip_gen: v6e
topology: v6e:2x2x1
jax: 0.10.0
libtpu: 0.0.40
codegen_flags: <defaults>
</compile_context>

<pallas_src>
import jax
import jax.numpy as jnp
from jax.experimental import pallas as pl
from jax.experimental.pallas import tpu as pltpu

IN_DIM = 784
HIDDEN = 400
HIDDEN_PAD = 512           # 400 -> 4*128 so h1/h3 are lane-dense
LATENT_DIM = 20
LATENT_PAD = 128           # latent padded to one full lane group
TILE_B_MAX = 256           # fills the 256x256 MXU on v6e/v7x


def _round_up(n, m):
    return ((n + m - 1) // m) * m


def _choose_tile_b(B):
    """Batch-aware tile: keep the grid >= 2 when possible (v7x megacore),
    cap at 256 rows (v6e/v7x MXU M-dim), always a multiple of 8 sublanes."""
    return min(TILE_B_MAX, max(8, _round_up((B + 1) // 2, 8)))


def _vae_kernel(x_ref, eps_ref,
                w1_ref, b1_ref,
                wms_ref, bms_ref,
                w3_ref, b3_ref,
                w4_ref, b4_ref,
                latent_ref, recon_ref):
    """One batch tile of the full VAE forward.

    latent_ref packs [mu | sigma | z] (each padded to LATENT_PAD lanes) so the
    small outputs go out in a single lane-dense slab. Weights are bf16; the MXU
    accumulates in f32; everything else runs in f32.
    """
    bf16 = jnp.bfloat16

    # ---------------- encoder ----------------
    x = x_ref[...].astype(bf16)
    h1 = jnp.dot(x, w1_ref[...], preferred_element_type=jnp.float32) + b1_ref[...]
    h1 = jnp.maximum(h1, 0.0)

    # Fused mu|sigma projection: wms is (HIDDEN_PAD, 2*LATENT_PAD) with w21 in
    # cols [0:LATENT_DIM] and w22 in cols [LATENT_PAD:LATENT_PAD+LATENT_DIM],
    # zeros elsewhere (so padded lanes come out exactly 0).
    ms = jnp.dot(h1.astype(bf16), wms_ref[...],
                 preferred_element_type=jnp.float32) + bms_ref[...]
    mu_pad = ms[:, :LATENT_PAD]
    sigma_pad = ms[:, LATENT_PAD:]

    # -------------- reparameterize --------------
    # sigma is the *raw* second head (no exp), exactly as in the spec's
    # reparameterize(); eps is supplied from outside (pad lanes are 0).
    z_pad = mu_pad + sigma_pad * eps_ref[...]

    # packed latent output: [mu_pad | sigma_pad | z_pad], 128-lane aligned stores
    latent_ref[:, : 2 * LATENT_PAD] = ms.astype(latent_ref.dtype)
    latent_ref[:, 2 * LATENT_PAD:] = z_pad.astype(latent_ref.dtype)

    # ---------------- decoder ----------------
    # w3 rows [LATENT_DIM:] are zero, so the padded z lanes contribute nothing.
    h3 = jnp.dot(z_pad.astype(bf16), w3_ref[...],
                 preferred_element_type=jnp.float32) + b3_ref[...]
    h3 = jnp.maximum(h3, 0.0)
    logits = jnp.dot(h3.astype(bf16), w4_ref[...],
                     preferred_element_type=jnp.float32) + b4_ref[...]
    recon_ref[...] = jax.nn.sigmoid(logits).astype(recon_ref.dtype)


def pack_params(p):
    """One-time packing: lane-pad to MXU-friendly shapes, weights -> bf16."""
    f32, bf16 = jnp.float32, jnp.bfloat16

    w1 = jnp.zeros((IN_DIM, HIDDEN_PAD), f32).at[:, :HIDDEN].set(p["w1"]).astype(bf16)
    b1 = jnp.zeros((1, HIDDEN_PAD), f32).at[:, :HIDDEN].set(p["b1"])

    wms = jnp.zeros((HIDDEN_PAD, 2 * LATENT_PAD), f32)
    wms = wms.at[:HIDDEN, :LATENT_DIM].set(p["w21"])
    wms = wms.at[:HIDDEN, LATENT_PAD:LATENT_PAD + LATENT_DIM].set(p["w22"]).astype(bf16)
    bms = jnp.zeros((1, 2 * LATENT_PAD), f32)
    bms = bms.at[:, :LATENT_DIM].set(p["b21"])
    bms = bms.at[:, LATENT_PAD:LATENT_PAD + LATENT_DIM].set(p["b22"])

    w3 = jnp.zeros((LATENT_PAD, HIDDEN_PAD), f32)
    w3 = w3.at[:LATENT_DIM, :HIDDEN].set(p["w3"]).astype(bf16)
    b3 = jnp.zeros((1, HIDDEN_PAD), f32).at[:, :HIDDEN].set(p["b3"])

    w4 = jnp.zeros((HIDDEN_PAD, IN_DIM), f32).at[:HIDDEN, :].set(p["w4"]).astype(bf16)
    b4 = p["b4"].astype(f32)                      # (1, 784), output stays 784 wide

    return {"w1": w1, "b1": b1, "wms": wms, "bms": bms,
            "w3": w3, "b3": b3, "w4": w4, "b4": b4}


@jax.jit
def vae_forward(x, eps, pk):
    """Full VAE forward in a single Pallas kernel with a batch-tiled grid."""
    B = x.shape[0]
    dt = jnp.float32

    tile_b = _choose_tile_b(B)
    b_pad = _round_up(B, tile_b)

    # Skip the x pad/copy entirely when B already tiles evenly (static check).
    if b_pad == B:
        x_in = x
    else:
        x_in = jnp.zeros((b_pad, IN_DIM), dt).at[:B, :].set(x)
    # eps must be lane-padded 20 -> 128 regardless (tiny: 512 B/row).
    eps_in = jnp.zeros((b_pad, LATENT_PAD), dt).at[:B, :LATENT_DIM].set(eps)

    grid = (b_pad // tile_b,)

    def btile(cols):                       # blocks indexed by the batch tile
        return pl.BlockSpec((tile_b, cols), lambda i: (i, 0))

    def resident(shape):                   # weights: same block for every tile
        return pl.BlockSpec(shape, lambda i: (0, 0))

    in_specs = [
        btile(IN_DIM),                               # x
        btile(LATENT_PAD),                           # eps (lane-padded)
        resident((IN_DIM, HIDDEN_PAD)),              # w1   (bf16)
        resident((1, HIDDEN_PAD)),                   # b1
        resident((HIDDEN_PAD, 2 * LATENT_PAD)),      # wms  (fused w21|w22, bf16)
        resident((1, 2 * LATENT_PAD)),               # bms
        resident((LATENT_PAD, HIDDEN_PAD)),          # w3   (K padded to 128, bf16)
        resident((1, HIDDEN_PAD)),                   # b3
        resident((HIDDEN_PAD, IN_DIM)),              # w4   (bf16, N = 784)
        resident((1, IN_DIM)),                       # b4
    ]
    out_specs = (
        btile(3 * LATENT_PAD),                       # packed [mu | sigma | z]
        btile(IN_DIM),                               # reconstruction, 784 wide
    )
    out_shapes = (
        jax.ShapeDtypeStruct((b_pad, 3 * LATENT_PAD), dt),
        jax.ShapeDtypeStruct((b_pad, IN_DIM), dt),
    )

    latent, recon = pl.pallas_call(
        _vae_kernel,
        out_shape=out_shapes,
        grid_spec=pltpu.PrefetchScalarGridSpec(
            num_scalar_prefetch=0,
            grid=grid,
            in_specs=in_specs,
            out_specs=out_specs,
        ),
        compiler_params=pltpu.CompilerParams(
            dimension_semantics=("parallel",),   # shard batch tiles over TCs (v7x)
            vmem_limit_bytes=32 << 20,
        ),
    )(x_in, eps_in, pk["w1"], pk["b1"], pk["wms"], pk["bms"],
      pk["w3"], pk["b3"], pk["w4"], pk["b4"])

    mu = latent[:B, 0:LATENT_DIM]
    sigma = latent[:B, LATENT_PAD:LATENT_PAD + LATENT_DIM]
    z = latent[:B, 2 * LATENT_PAD:2 * LATENT_PAD + LATENT_DIM]
    if b_pad != B:
        recon = recon[:B]
    return mu, sigma, z, recon


def init_params(key, latent_dim=LATENT_DIM):
    """nn.Linear-style init U(-1/sqrt(fan_in), 1/sqrt(fan_in)).

    Weights stored as (in_features, out_features) (transposed vs PyTorch) so the
    kernel computes x @ W; biases as (1, N) rows. All f32 (packed to bf16 later).
    """
    def linear(k, fan_in, fan_out):
        kw, kb = jax.random.split(k)
        bound = 1.0 / jnp.sqrt(fan_in)
        w = jax.random.uniform(kw, (fan_in, fan_out), jnp.float32, -bound, bound)
        b = jax.random.uniform(kb, (1, fan_out), jnp.float32, -bound, bound)
        return w, b

    k1, k21, k22, k3, k4 = jax.random.split(key, 5)
    params = {}
    params["w1"], params["b1"] = linear(k1, IN_DIM, HIDDEN)
    params["w21"], params["b21"] = linear(k21, HIDDEN, latent_dim)
    params["w22"], params["b22"] = linear(k22, HIDDEN, latent_dim)
    params["w3"], params["b3"] = linear(k3, latent_dim, HIDDEN)
    params["w4"], params["b4"] = linear(k4, HIDDEN, IN_DIM)
    return params


def vae_forward_ref(x, eps, p):
    """Pure-JAX f32 reference mirroring the PyTorch module's forward."""
    h1 = jnp.maximum(x @ p["w1"] + p["b1"], 0.0)
    mu = h1 @ p["w21"] + p["b21"]
    sigma = h1 @ p["w22"] + p["b22"]
    z = mu + sigma * eps
    h3 = jnp.maximum(z @ p["w3"] + p["b3"], 0.0)
    recon = jax.nn.sigmoid(h3 @ p["w4"] + p["b4"])
    return mu, sigma, z, recon


if __name__ == "__main__":
    key = jax.random.PRNGKey(0)
    k_params, k_x, k_eps = jax.random.split(key, 3)

    B = 8
    params = init_params(k_params)
    packed = pack_params(params)   # one-time packing (amortized across calls)

    # Inputs to the module are flattened MNIST-style images (B, 784).
    x = jax.random.uniform(k_x, (B, IN_DIM), jnp.float32)        # pixel-like in [0,1)
    eps = jax.random.normal(k_eps, (B, LATENT_DIM), jnp.float32)

    mu, sigma, z, recon = vae_forward(x, eps, packed)
    jax.block_until_ready((mu, sigma, z, recon))

    # correctness check vs. plain-JAX f32 reference (kernel matmuls are bf16
    # with f32 accumulation, so the tolerance is loosened accordingly)
    mu_r, sigma_r, z_r, recon_r = vae_forward_ref(x, eps, params)
    assert jnp.allclose(mu, mu_r, atol=3e-2, rtol=3e-2)
    assert jnp.allclose(sigma, sigma_r, atol=3e-2, rtol=3e-2)
    assert jnp.allclose(z, z_r, atol=3e-2, rtol=3e-2)
    assert jnp.allclose(recon, recon_r, atol=3e-2, rtol=3e-2)

    print("KERNEL_OK")
</pallas_src>

<mosaic_0001>
module attributes {stable_mosaic.version = 11 : i64} {
  func.func @_vae_kernel(%arg0: i32, %arg1: memref<8x784xf32, #tpu.memory_space<vmem>>, %arg2: memref<8x128xf32, #tpu.memory_space<vmem>>, %arg3: memref<784x512xbf16, #tpu.memory_space<vmem>>, %arg4: memref<1x512xf32, #tpu.memory_space<vmem>>, %arg5: memref<512x256xbf16, #tpu.memory_space<vmem>>, %arg6: memref<1x256xf32, #tpu.memory_space<vmem>>, %arg7: memref<128x512xbf16, #tpu.memory_space<vmem>>, %arg8: memref<1x512xf32, #tpu.memory_space<vmem>>, %arg9: memref<512x784xbf16, #tpu.memory_space<vmem>>, %arg10: memref<1x784xf32, #tpu.memory_space<vmem>>, %arg11: memref<8x384xf32, #tpu.memory_space<vmem>>, %arg12: memref<8x784xf32, #tpu.memory_space<vmem>>) attributes {dimension_semantics = [#tpu.dimension_semantics<parallel>], iteration_bounds = array<i64: 1>, scalar_prefetch = 0 : i64, scratch_operands = 0 : i64, tpu.core_type = #tpu.core_type<tc>, window_params = [{transform_indices = @transform_0, window_bounds = array<i64: 8, 784>}, {transform_indices = @transform_1, window_bounds = array<i64: 8, 128>}, {pipeline_mode = #tpu.pipeline_mode<synchronous>, transform_indices = @transform_2, window_bounds = array<i64: 784, 512>}, {pipeline_mode = #tpu.pipeline_mode<synchronous>, transform_indices = @transform_3, window_bounds = array<i64: 1, 512>}, {pipeline_mode = #tpu.pipeline_mode<synchronous>, transform_indices = @transform_4, window_bounds = array<i64: 512, 256>}, {pipeline_mode = #tpu.pipeline_mode<synchronous>, transform_indices = @transform_5, window_bounds = array<i64: 1, 256>}, {pipeline_mode = #tpu.pipeline_mode<synchronous>, transform_indices = @transform_6, window_bounds = array<i64: 128, 512>}, {pipeline_mode = #tpu.pipeline_mode<synchronous>, transform_indices = @transform_7, window_bounds = array<i64: 1, 512>}, {pipeline_mode = #tpu.pipeline_mode<synchronous>, transform_indices = @transform_8, window_bounds = array<i64: 512, 784>}, {pipeline_mode = #tpu.pipeline_mode<synchronous>, transform_indices = @transform_9, window_bounds = array<i64: 1, 784>}, {transform_indices = @transform_10, window_bounds = array<i64: 8, 384>}, {transform_indices = @transform_11, window_bounds = array<i64: 8, 784>}]} {
    %c0 = arith.constant 0 : index
    %c0_0 = arith.constant 0 : index
    %0 = vector.load %arg1[%c0, %c0_0] : memref<8x784xf32, #tpu.memory_space<vmem>>, vector<8x784xf32>
    %1 = arith.truncf %0 : vector<8x784xf32> to vector<8x784xbf16>
    %c0_1 = arith.constant 0 : index
    %c0_2 = arith.constant 0 : index
    %2 = vector.load %arg3[%c0_1, %c0_2] : memref<784x512xbf16, #tpu.memory_space<vmem>>, vector<784x512xbf16>
    %cst = arith.constant dense<0.000000e+00> : vector<8x512xf32>
    %3 = tpu.matmul %1, %2, %cst {dimension_numbers = #tpu.dot_dimension_numbers<[1], [0], [0], [1], [0, 0, 1, 1], [], []>} : vector<8x784xbf16>, vector<784x512xbf16>, vector<8x512xf32> -> vector<8x512xf32>
    %c0_3 = arith.constant 0 : index
    %c0_4 = arith.constant 0 : index
    %4 = vector.load %arg4[%c0_3, %c0_4] : memref<1x512xf32, #tpu.memory_space<vmem>>, vector<1x512xf32>
    %5 = vector.broadcast %4 : vector<1x512xf32> to vector<8x512xf32>
    %6 = arith.addf %3, %5 : vector<8x512xf32>
    %cst_5 = arith.constant 0.000000e+00 : f32
    %7 = vector.broadcast %cst_5 : f32 to vector<8x512xf32>
    %8 = arith.maximumf %6, %7 : vector<8x512xf32>
    %9 = arith.truncf %8 : vector<8x512xf32> to vector<8x512xbf16>
    %c0_6 = arith.constant 0 : index
    %c0_7 = arith.constant 0 : index
    %10 = vector.load %arg5[%c0_6, %c0_7] : memref<512x256xbf16, #tpu.memory_space<vmem>>, vector<512x256xbf16>
    %cst_8 = arith.constant dense<0.000000e+00> : vector<8x256xf32>
    %11 = tpu.matmul %9, %10, %cst_8 {dimension_numbers = #tpu.dot_dimension_numbers<[1], [0], [0], [1], [0, 0, 1, 1], [], []>} : vector<8x512xbf16>, vector<512x256xbf16>, vector<8x256xf32> -> vector<8x256xf32>
    %c0_9 = arith.constant 0 : index
    %c0_10 = arith.constant 0 : index
    %12 = vector.load %arg6[%c0_9, %c0_10] : memref<1x256xf32, #tpu.memory_space<vmem>>, vector<1x256xf32>
    %13 = vector.broadcast %12 : vector<1x256xf32> to vector<8x256xf32>
    %14 = arith.addf %11, %13 : vector<8x256xf32>
    %15 = vector.extract_strided_slice %14 {offsets = [0, 0], sizes = [8, 128], strides = [1, 1]} : vector<8x256xf32> to vector<8x128xf32>
    %16 = vector.extract_strided_slice %14 {offsets = [0, 128], sizes = [8, 128], strides = [1, 1]} : vector<8x256xf32> to vector<8x128xf32>
    %c0_11 = arith.constant 0 : index
    %c0_12 = arith.constant 0 : index
    %17 = vector.load %arg2[%c0_11, %c0_12] : memref<8x128xf32, #tpu.memory_space<vmem>>, vector<8x128xf32>
    %18 = arith.mulf %16, %17 : vector<8x128xf32>
    %19 = arith.addf %15, %18 : vector<8x128xf32>
    %c0_13 = arith.constant 0 : index
    %c0_14 = arith.constant 0 : index
    %20 = vector.load %arg11[%c0_13, %c0_14] : memref<8x384xf32, #tpu.memory_space<vmem>>, vector<8x256xf32>
    tpu.vector_store %arg11[%c0_13, %c0_14], %14 {strides = array<i32>} : memref<8x384xf32, #tpu.memory_space<vmem>>, vector<8x256xf32>,
    %c0_15 = arith.constant 0 : index
    %c256 = arith.constant 256 : index
    %21 = vector.load %arg11[%c0_15, %c256] : memref<8x384xf32, #tpu.memory_space<vmem>>, vector<8x128xf32>
    tpu.vector_store %arg11[%c0_15, %c256], %19 {strides = array<i32>} : memref<8x384xf32, #tpu.memory_space<vmem>>, vector<8x128xf32>,
    %22 = arith.truncf %19 : vector<8x128xf32> to vector<8x128xbf16>
    %c0_16 = arith.constant 0 : index
    %c0_17 = arith.constant 0 : index
    %23 = vector.load %arg7[%c0_16, %c0_17] : memref<128x512xbf16, #tpu.memory_space<vmem>>, vector<128x512xbf16>
    %cst_18 = arith.constant dense<0.000000e+00> : vector<8x512xf32>
    %24 = tpu.matmul %22, %23, %cst_18 {dimension_numbers = #tpu.dot_dimension_numbers<[1], [0], [0], [1], [0, 0, 1, 1], [], []>} : vector<8x128xbf16>, vector<128x512xbf16>, vector<8x512xf32> -> vector<8x512xf32>
    %c0_19 = arith.constant 0 : index
    %c0_20 = arith.constant 0 : index
    %25 = vector.load %arg8[%c0_19, %c0_20] : memref<1x512xf32, #tpu.memory_space<vmem>>, vector<1x512xf32>
    %26 = vector.broadcast %25 : vector<1x512xf32> to vector<8x512xf32>
    %27 = arith.addf %24, %26 : vector<8x512xf32>
    %cst_21 = arith.constant 0.000000e+00 : f32
    %28 = vector.broadcast %cst_21 : f32 to vector<8x512xf32>
    %29 = arith.maximumf %27, %28 : vector<8x512xf32>
    %30 = arith.truncf %29 : vector<8x512xf32> to vector<8x512xbf16>
    %c0_22 = arith.constant 0 : index
    %c0_23 = arith.constant 0 : index
    %31 = vector.load %arg9[%c0_22, %c0_23] : memref<512x784xbf16, #tpu.memory_space<vmem>>, vector<512x784xbf16>
    %cst_24 = arith.constant dense<0.000000e+00> : vector<8x784xf32>
    %32 = tpu.matmul %30, %31, %cst_24 {dimension_numbers = #tpu.dot_dimension_numbers<[1], [0], [0], [1], [0, 0, 1, 1], [], []>} : vector<8x512xbf16>, vector<512x784xbf16>, vector<8x784xf32> -> vector<8x784xf32>
    %c0_25 = arith.constant 0 : index
    %c0_26 = arith.constant 0 : index
    %33 = vector.load %arg10[%c0_25, %c0_26] : memref<1x784xf32, #tpu.memory_space<vmem>>, vector<1x784xf32>
    %34 = vector.broadcast %33 : vector<1x784xf32> to vector<8x784xf32>
    %35 = arith.addf %32, %34 : vector<8x784xf32>
    %36 = arith.negf %35 : vector<8x784xf32>
    %37 = math.exp %36 : vector<8x784xf32>
    %cst_27 = arith.constant 1.000000e+00 : f32
    %38 = vector.broadcast %cst_27 : f32 to vector<8x784xf32>
    %39 = arith.addf %38, %37 : vector<8x784xf32>
    %40 = arith.divf %38, %39 : vector<8x784xf32>
    %c0_28 = arith.constant 0 : index
    %c0_29 = arith.constant 0 : index
    %41 = vector.load %arg12[%c0_28, %c0_29] : memref<8x784xf32, #tpu.memory_space<vmem>>, vector<8x784xf32>
    tpu.vector_store %arg12[%c0_28, %c0_29], %40 {strides = array<i32>} : memref<8x784xf32, #tpu.memory_space<vmem>>, vector<8x784xf32>,
    return
  }
  func.func @transform_0(%arg0: i32) -> (i32, i32) {
    %c0_i32 = arith.constant 0 : i32
    %c0_i32_0 = arith.constant 0 : i32
    return %arg0, %c0_i32 : i32, i32
  }
  func.func @transform_1(%arg0: i32) -> (i32, i32) {
    %c0_i32 = arith.constant 0 : i32
    %c0_i32_0 = arith.constant 0 : i32
    return %arg0, %c0_i32 : i32, i32
  }
  func.func @transform_2(%arg0: i32) -> (i32, i32) {
    %c0_i32 = arith.constant 0 : i32
    %c0_i32_0 = arith.constant 0 : i32
    %c0_i32_1 = arith.constant 0 : i32
    return %c0_i32, %c0_i32_0 : i32, i32
  }
  func.func @transform_3(%arg0: i32) -> (i32, i32) {
    %c0_i32 = arith.constant 0 : i32
    %c0_i32_0 = arith.constant 0 : i32
    %c0_i32_1 = arith.constant 0 : i32
    return %c0_i32, %c0_i32_0 : i32, i32
  }
  func.func @transform_4(%arg0: i32) -> (i32, i32) {
    %c0_i32 = arith.constant 0 : i32
    %c0_i32_0 = arith.constant 0 : i32
    %c0_i32_1 = arith.constant 0 : i32
    return %c0_i32, %c0_i32_0 : i32, i32
  }
  func.func @transform_5(%arg0: i32) -> (i32, i32) {
    %c0_i32 = arith.constant 0 : i32
    %c0_i32_0 = arith.constant 0 : i32
    %c0_i32_1 = arith.constant 0 : i32
    return %c0_i32, %c0_i32_0 : i32, i32
  }
  func.func @transform_6(%arg0: i32) -> (i32, i32) {
    %c0_i32 = arith.constant 0 : i32
    %c0_i32_0 = arith.constant 0 : i32
    %c0_i32_1 = arith.constant 0 : i32
    return %c0_i32, %c0_i32_0 : i32, i32
  }
  func.func @transform_7(%arg0: i32) -> (i32, i32) {
    %c0_i32 = arith.constant 0 : i32
    %c0_i32_0 = arith.constant 0 : i32
    %c0_i32_1 = arith.constant 0 : i32
    return %c0_i32, %c0_i32_0 : i32, i32
  }
  func.func @transform_8(%arg0: i32) -> (i32, i32) {
    %c0_i32 = arith.constant 0 : i32
    %c0_i32_0 = arith.constant 0 : i32
    %c0_i32_1 = arith.constant 0 : i32
    return %c0_i32, %c0_i32_0 : i32, i32
  }
  func.func @transform_9(%arg0: i32) -> (i32, i32) {
    %c0_i32 = arith.constant 0 : i32
    %c0_i32_0 = arith.constant 0 : i32
    %c0_i32_1 = arith.constant 0 : i32
    return %c0_i32, %c0_i32_0 : i32, i32
  }
  func.func @transform_10(%arg0: i32) -> (i32, i32) {
    %c0_i32 = arith.constant 0 : i32
    %c0_i32_0 = arith.constant 0 : i32
    return %arg0, %c0_i32 : i32, i32
  }
  func.func @transform_11(%arg0: i32) -> (i32, i32) {
    %c0_i32 = arith.constant 0 : i32
    %c0_i32_0 = arith.constant 0 : i32
    return %arg0, %c0_i32 : i32, i32
  }
}

</mosaic_0001>

<bundles_post_ra>
// kernel: vae_forward.1
= control target key start
LH: loop header
LB: loop body
LE: loop exit
PB: predicated region body
PF: predicated region fallthrough
CT: control target
= control target key end

     0   :  { %vm1251_vm0 = vcmask 130048   ;;  %s7354_s0 = inlined_call_operand.vmem [shape: f32[8,784], index: 0, kind: input, shape index: {}]   ;;  %s7355_s1 = inlined_call_operand.vmem [shape: f32[8,128], index: 1, kind: input, shape index: {}]   ;;  %s7356_s2 = inlined_call_operand.vmem [shape: bf16[784,512], index: 2, kind: input, shape index: {}]   ;;  %s7357_s3 = inlined_call_operand.vmem [shape: f32[1,512], index: 3, kind: input, shape index: {}]   ;;  %s7358_s4 = inlined_call_operand.vmem [shape: bf16[512,256], index: 4, kind: input, shape index: {}]   ;;  %s7359_s5 = inlined_call_operand.vmem [shape: f32[1,256], index: 5, kind: input, shape index: {}]   ;;  %s7360_s6 = inlined_call_operand.vmem [shape: bf16[128,512], index: 6, kind: input, shape index: {}]   ;;  %s7361_s7 = inlined_call_operand.vmem [shape: f32[1,512], index: 7, kind: input, shape index: {}]   ;;  %s7362_s8 = inlined_call_operand.vmem [shape: bf16[512,784], index: 8, kind: input, shape index: {}]   ;;  %s7363_s9 = inlined_call_operand.vmem [shape: f32[1,784], index: 9, kind: input, shape index: {}]   ;;  %s7364_s10 = inlined_call_operand.vmem [shape: f32[8,384], index: 10, kind: output, shape index: {0}]   ;;  %s7365_s11 = inlined_call_operand.hbm [shape: f32[8,784], index: 11, kind: output, shape index: {1}]  }
   0x1   :  { %v4789_v0 = vld [vmem:[%s7356_s2 + $0xe4] ss:$16 sps:$4 sm:$0xff]   ;;  %v4793_v2 = vld [vmem:[%s7356_s2 + $0xe0] ss:$16 sps:$4 sm:$0xff]   ;;  %v40_v46 = vld [vmem:[%s7354_s0 + $0x8] sm:$0xff] }
   0x2   :  { %v4791_v1 = vld [vmem:[%s7356_s2 + $0x2e4] ss:$16 sps:$4 sm:$0xff]   ;;  %1255 = vmatprep.subr.bf16.mxu0 %v4789_v0  ;;  %v4794_v3 = vld [vmem:[%s7356_s2 + $0x2e0] ss:$16 sps:$4 sm:$0xff]   ;;  %v5806_v49 = vpack.c.bf16 %v40_v46, %v40_v46  ;;  %v42_v50 = vld [vmem:[%s7354_s0 + $0x18] sm:$0xff] }
   0x3   :  { %1296 = vmatprep.subr.bf16.mxu1 %v4791_v1  ;;  %v4795_v4 = vld [vmem:[%s7356_s2 + $0xc4] ss:$16 sps:$4 sm:$0xff]   ;;  %1256 = vmatpush1.bf16.msra.mxu0 %v4793_v2  ;;  %v4799_v6 = vld [vmem:[%s7356_s2 + $0xc0] ss:$16 sps:$4 sm:$0xff]   ;;  %v5814_v52 = vpack.c.bf16 %v42_v50, %v42_v50 }
   0x4   :  { %1297 = vmatpush1.bf16.msra.mxu1 %v4794_v3  ;;  %v4797_v5 = vld [vmem:[%s7356_s2 + $0x2c4] ss:$16 sps:$4 sm:$0xff]   ;;  %1257 = vmatprep.subr.bf16.mxu0 %v4795_v4  ;;  %v4800_v7 = vld [vmem:[%s7356_s2 + $0x2c0] ss:$16 sps:$4 sm:$0xff]  }
   0x5   :  { %1298 = vmatprep.subr.bf16.mxu1 %v4797_v5  ;;  %v4801_v8 = vld [vmem:[%s7356_s2 + $0xa4] ss:$16 sps:$4 sm:$0xff]   ;;  %v4805_v10 = vld [vmem:[%s7356_s2 + $0xa0] ss:$16 sps:$4 sm:$0xff]   ;;  %1287 = vmatprep.mubr.bf16.mxu0 %v5806_v49 }
   0x6   :  { %v4803_v9 = vld [vmem:[%s7356_s2 + $0x2a4] ss:$16 sps:$4 sm:$0xff]   ;;  %v4806_v11 = vld [vmem:[%s7356_s2 + $0x2a0] ss:$16 sps:$4 sm:$0xff]   ;;  %1328 = vmatprep.mubr.bf16.mxu1 %v5814_v52 }
   0x7   :  { %1258 = vmatpush1.bf16.msra.mxu0 %v4799_v6  ;;  %v4807_v12 = vld [vmem:[%s7356_s2 + $0x84] ss:$16 sps:$4 sm:$0xff]   ;;  %v4811_v14 = vld [vmem:[%s7356_s2 + $0x80] ss:$16 sps:$4 sm:$0xff]  }
   0x8   :  { %1299 = vmatpush1.bf16.msra.mxu1 %v4800_v7  ;;  %1259 = vmatprep.subr.bf16.mxu0 %v4801_v8  ;;  %v4809_v13 = vld [vmem:[%s7356_s2 + $0x284] ss:$16 sps:$4 sm:$0xff]   ;;  %v4812_v15 = vld [vmem:[%s7356_s2 + $0x280] ss:$16 sps:$4 sm:$0xff]  }
   0x9   :  { %1300 = vmatprep.subr.bf16.mxu1 %v4803_v9  ;;  %v4813_v16 = vld [vmem:[%s7356_s2 + $0x64] ss:$16 sps:$4 sm:$0xff]   ;;  %v4817_v18 = vld [vmem:[%s7356_s2 + $0x60] ss:$16 sps:$4 sm:$0xff]  }
   0xa   :  { %v4815_v17 = vld [vmem:[%s7356_s2 + $0x264] ss:$16 sps:$4 sm:$0xff]   ;;  %v4818_v19 = vld [vmem:[%s7356_s2 + $0x260] ss:$16 sps:$4 sm:$0xff]  }
   0xb   :  { %1260 = vmatpush1.bf16.msra.mxu0 %v4805_v10  ;;  %v4819_v20 = vld [vmem:[%s7356_s2 + $0x44] ss:$16 sps:$4 sm:$0xff]   ;;  %v4823_v22 = vld [vmem:[%s7356_s2 + $0x40] ss:$16 sps:$4 sm:$0xff]  }
   0xc   :  { %1301 = vmatpush1.bf16.msra.mxu1 %v4806_v11  ;;  %1261 = vmatprep.subr.bf16.mxu0 %v4807_v12  ;;  %v4821_v21 = vld [vmem:[%s7356_s2 + $0x244] ss:$16 sps:$4 sm:$0xff]   ;;  %v4824_v23 = vld [vmem:[%s7356_s2 + $0x240] ss:$16 sps:$4 sm:$0xff]  }
   0xd   :  { %1302 = vmatprep.subr.bf16.mxu1 %v4809_v13  ;;  %v4825_v24 = vld [vmem:[%s7356_s2 + $0x24] ss:$16 sps:$4 sm:$0xff]   ;;  %v4829_v26 = vld [vmem:[%s7356_s2 + $0x20] ss:$16 sps:$4 sm:$0xff]   ;;  %v4896_v13 = vld [vmem:[%s7356_s2 + $0xec] ss:$16 sps:$4 sm:$0xff]  }
   0xe   :  { %v4827_v25 = vld [vmem:[%s7356_s2 + $0x224] ss:$16 sps:$4 sm:$0xff]   ;;  %v4830_v27 = vld [vmem:[%s7356_s2 + $0x220] ss:$16 sps:$4 sm:$0xff]  }
   0xf   :  { %1262 = vmatpush1.bf16.msra.mxu0 %v4811_v14  ;;  %v4831_v28 = vld [vmem:[%s7356_s2 + $0x4] ss:$16 sps:$4 sm:$0xff]   ;;  %v4835_v30 = vld [vmem:[%s7356_s2] ss:$16 sps:$4 sm:$0xff]  }
  0x10   :  { %1303 = vmatpush1.bf16.msra.mxu1 %v4812_v15  ;;  %1263 = vmatprep.subr.bf16.mxu0 %v4813_v16  ;;  %v4833_v29 = vld [vmem:[%s7356_s2 + $0x204] ss:$16 sps:$4 sm:$0xff]   ;;  %v4836_v31 = vld [vmem:[%s7356_s2 + $0x200] ss:$16 sps:$4 sm:$0xff]   ;;  %v5597_v16 = vmov 0  }
  0x11   :  { %1304 = vmatprep.subr.bf16.mxu1 %v4815_v17  ;;  %v4837_v32 = vld [vmem:[%s7356_s2 + $0x1e4] ss:$16 sps:$4 sm:$0xff]   ;;  %v4841_v34 = vld [vmem:[%s7356_s2 + $0x1e0] ss:$16 sps:$4 sm:$0xff]  }
  0x12   :  { %v4839_v33 = vld [vmem:[%s7356_s2 + $0x3e4] ss:$16 sps:$4 sm:$0xff]   ;;  %v4842_v35 = vld [vmem:[%s7356_s2 + $0x3e0] ss:$16 sps:$4 sm:$0xff]  }
  0x13   :  { %1264 = vmatpush1.bf16.msra.mxu0 %v4817_v18  ;;  %v4843_v36 = vld [vmem:[%s7356_s2 + $0x1c4] ss:$16 sps:$4 sm:$0xff]   ;;  %v4847_v38 = vld [vmem:[%s7356_s2 + $0x1c0] ss:$16 sps:$4 sm:$0xff]   ;;  %v4894_v18 = vld [vmem:[%s7356_s2 + $0xe8] ss:$16 sps:$4 sm:$0xff]  }
  0x14   :  { %1305 = vmatpush1.bf16.msra.mxu1 %v4818_v19  ;;  %1265 = vmatprep.subr.bf16.mxu0 %v4819_v20  ;;  %v4845_v37 = vld [vmem:[%s7356_s2 + $0x3c4] ss:$16 sps:$4 sm:$0xff]   ;;  %v4848_v39 = vld [vmem:[%s7356_s2 + $0x3c0] ss:$16 sps:$4 sm:$0xff]  }
  0x15   :  { %1306 = vmatprep.subr.bf16.mxu1 %v4821_v21  ;;  %v4849_v40 = vld [vmem:[%s7356_s2 + $0x1a4] ss:$16 sps:$4 sm:$0xff]   ;;  %v4853_v42 = vld [vmem:[%s7356_s2 + $0x1a0] ss:$16 sps:$4 sm:$0xff]   ;;  %v4902_v21 = vld [vmem:[%s7356_s2 + $0xcc] ss:$16 sps:$4 sm:$0xff]  }
  0x16   :  { %v4851_v41 = vld [vmem:[%s7356_s2 + $0x3a4] ss:$16 sps:$4 sm:$0xff]   ;;  %v4854_v43 = vld [vmem:[%s7356_s2 + $0x3a0] ss:$16 sps:$4 sm:$0xff]  }
  0x17   :  { %1266 = vmatpush1.bf16.msra.mxu0 %v4823_v22  ;;  %v4855_v44 = vld [vmem:[%s7356_s2 + $0x184] ss:$16 sps:$4 sm:$0xff]   ;;  %v4859_v47 = vld [vmem:[%s7356_s2 + $0x180] ss:$16 sps:$4 sm:$0xff]  }
  0x18   :  { %1307 = vmatpush1.bf16.msra.mxu1 %v4824_v23  ;;  %1267 = vmatprep.subr.bf16.mxu0 %v4825_v24  ;;  %v4857_v45 = vld [vmem:[%s7356_s2 + $0x384] ss:$16 sps:$4 sm:$0xff]   ;;  %v4860_v48 = vld [vmem:[%s7356_s2 + $0x380] ss:$16 sps:$4 sm:$0xff]   ;;  %v4900_v23 = vld [vmem:[%s7356_s2 + $0xc8] ss:$16 sps:$4 sm:$0xff]  }
  0x19   :  { %1308 = vmatprep.subr.bf16.mxu1 %v4827_v25  ;;  %v4861_v51 = vld [vmem:[%s7356_s2 + $0x164] ss:$16 sps:$4 sm:$0xff]   ;;  %v4865_v54 = vld [vmem:[%s7356_s2 + $0x160] ss:$16 sps:$4 sm:$0xff]   ;;  %v4908_v25 = vld [vmem:[%s7356_s2 + $0xac] ss:$16 sps:$4 sm:$0xff]  }
  0x1a   :  { %v4863_v53 = vld [vmem:[%s7356_s2 + $0x364] ss:$16 sps:$4 sm:$0xff]   ;;  %v4866_v55 = vld [vmem:[%s7356_s2 + $0x360] ss:$16 sps:$4 sm:$0xff]  }
  0x1b   :  { %1268 = vmatpush1.bf16.msra.mxu0 %v4829_v26  ;;  %v4867_v56 = vld [vmem:[%s7356_s2 + $0x144] ss:$16 sps:$4 sm:$0xff]   ;;  %v4871_v58 = vld [vmem:[%s7356_s2 + $0x140] ss:$16 sps:$4 sm:$0xff]  }
  0x1c   :  { %1309 = vmatpush1.bf16.msra.mxu1 %v4830_v27  ;;  %1269 = vmatprep.subr.bf16.mxu0 %v4831_v28  ;;  %v4869_v57 = vld [vmem:[%s7356_s2 + $0x344] ss:$16 sps:$4 sm:$0xff]   ;;  %v4872_v59 = vld [vmem:[%s7356_s2 + $0x340] ss:$16 sps:$4 sm:$0xff]   ;;  %v4906_v27 = vld [vmem:[%s7356_s2 + $0xa8] ss:$16 sps:$4 sm:$0xff]  }
  0x1d   :  { %1310 = vmatprep.subr.bf16.mxu1 %v4833_v29  ;;  %v4873_v60 = vld [vmem:[%s7356_s2 + $0x124] ss:$16 sps:$4 sm:$0xff]   ;;  %v4877_v62 = vld [vmem:[%s7356_s2 + $0x120] ss:$16 sps:$4 sm:$0xff]   ;;  %v4914_v29 = vld [vmem:[%s7356_s2 + $0x8c] ss:$16 sps:$4 sm:$0xff]  }
  0x1e   :  { %v4875_v61 = vld [vmem:[%s7356_s2 + $0x324] ss:$16 sps:$4 sm:$0xff]   ;;  %v4878_v63 = vld [vmem:[%s7356_s2 + $0x320] ss:$16 sps:$4 sm:$0xff]  }
  0x1f   :  { %1270 = vmatpush1.bf16.msra.mxu0 %v4835_v30  ;;  %v4879_v0 = vld [vmem:[%s7356_s2 + $0x104] ss:$16 sps:$4 sm:$0xff]   ;;  %v4883_v2 = vld [vmem:[%s7356_s2 + $0x100] ss:$16 sps:$4 sm:$0xff]  }
  0x20   :  { %1311 = vmatpush1.bf16.msra.mxu1 %v4836_v31  ;;  %1271 = vmatprep.subr.bf16.mxu0 %v4837_v32  ;;  %v4881_v1 = vld [vmem:[%s7356_s2 + $0x304] ss:$16 sps:$4 sm:$0xff]   ;;  %v4884_v3 = vld [vmem:[%s7356_s2 + $0x300] ss:$16 sps:$4 sm:$0xff]   ;;  %v4912_v31 = vld [vmem:[%s7356_s2 + $0x88] ss:$16 sps:$4 sm:$0xff]  }
  0x21   :  { %1312 = vmatprep.subr.bf16.mxu1 %v4839_v33  ;;  %v39_v4 = vld [vmem:[%s7354_s0] sm:$0xff]  ;;  %v41_v5 = vld [vmem:[%s7354_s0 + $0x10] sm:$0xff]  ;;  %v4920_v33 = vld [vmem:[%s7356_s2 + $0x6c] ss:$16 sps:$4 sm:$0xff]  }
  0x22   :  { %v4887_v6 = vld [vmem:[%s7356_s2 + $0x4e4] ss:$16 sps:$4 sm:$0xff]   ;;  %v5875_v8 = vpack.c.bf16 %v39_v4, %v39_v4  ;;  %v5877_v9 = vpack.c.bf16 %v41_v5, %v41_v5  ;;  %v4885_v10 = vld [vmem:[%s7356_s2 + $0x4e0] ss:$16 sps:$4 sm:$0xff]   ;;  %v4968_v4 = vld [vmem:[%s7356_s2 + $0x16c] ss:$16 sps:$4 sm:$0xff]  }
  0x23   :  { %1272 = vmatpush2.bf16.msra.mxu0 %v4841_v34  ;;  %v4890_v7 = vld [vmem:[%s7356_s2 + $0x604] ss:$16 sps:$4 sm:$0xff]   ;;  %v4888_v11 = vld [vmem:[%s7356_s2 + $0x600] ss:$16 sps:$4 sm:$0xff]  }
  0x24   :  { %1313 = vmatpush2.bf16.msra.mxu1 %v4842_v35  ;;  %1273 = vmatprep.subr.bf16.mxu0 %v4843_v36  ;;  %v4893_v12 = vld [vmem:[%s7356_s2 + $0x4c4] ss:$16 sps:$4 sm:$0xff]   ;;  %v4891_v14 = vld [vmem:[%s7356_s2 + $0x4c0] ss:$16 sps:$4 sm:$0xff]   ;;  %v44_v35 = vld [vmem:[%s7354_s0 + $0x28] sm:$0xff] }
  0x25   :  { %1314 = vmatprep.subr.bf16.mxu1 %v4845_v37  ;;  %v45_v15 = vld [vmem:[%s7354_s0 + $0x30] sm:$0xff]  ;;  %v5959_v36 = vpack.c.bf16 %v44_v35, %v44_v35  ;;  %v4918_v37 = vld [vmem:[%s7356_s2 + $0x68] ss:$16 sps:$4 sm:$0xff]  }
  0x26   :  { %v4899_v17 = vld [vmem:[%s7356_s2 + $0x4a4] ss:$16 sps:$4 sm:$0xff]   ;;  %v5906_v19 = vpack.c.bf16 %v45_v15, %v45_v15  ;;  %v4897_v20 = vld [vmem:[%s7356_s2 + $0x4a0] ss:$16 sps:$4 sm:$0xff]   ;;  %v5002_v35 = vld [vmem:[%s7356_s2 + $0x4a8] ss:$16 sps:$4 sm:$0xff]  }
  0x27   :  { %1274 = vmatpush2.bf16.msra.mxu0 %v4847_v38  ;;  %v4905_v22 = vld [vmem:[%s7356_s2 + $0x484] ss:$16 sps:$4 sm:$0xff]   ;;  %v4903_v24 = vld [vmem:[%s7356_s2 + $0x480] ss:$16 sps:$4 sm:$0xff]  }
  0x28   :  { %1315 = vmatpush2.bf16.msra.mxu1 %v4848_v39  ;;  %1275 = vmatprep.subr.bf16.mxu0 %v4849_v40  ;;  %v4911_v26 = vld [vmem:[%s7356_s2 + $0x464] ss:$16 sps:$4 sm:$0xff]   ;;  %v4909_v28 = vld [vmem:[%s7356_s2 + $0x460] ss:$16 sps:$4 sm:$0xff]   ;;  %v4926_v39 = vld [vmem:[%s7356_s2 + $0x4c] ss:$16 sps:$4 sm:$0xff]  }
  0x29   :  { %1316 = vmatprep.subr.bf16.mxu1 %v4851_v41  ;;  %v4917_v30 = vld [vmem:[%s7356_s2 + $0x444] ss:$16 sps:$4 sm:$0xff]   ;;  %v4915_v32 = vld [vmem:[%s7356_s2 + $0x440] ss:$16 sps:$4 sm:$0xff]   ;;  %v4924_v41 = vld [vmem:[%s7356_s2 + $0x48] ss:$16 sps:$4 sm:$0xff]  }
  0x2a   :  { %v4923_v34 = vld [vmem:[%s7356_s2 + $0x424] ss:$16 sps:$4 sm:$0xff]   ;;  %v4921_v38 = vld [vmem:[%s7356_s2 + $0x420] ss:$16 sps:$4 sm:$0xff]  }
  0x2b   :  { %1276 = vmatpush2.bf16.msra.mxu0 %v4853_v42  ;;  %v4929_v40 = vld [vmem:[%s7356_s2 + $0x404] ss:$16 sps:$4 sm:$0xff]   ;;  %v4927_v42 = vld [vmem:[%s7356_s2 + $0x400] ss:$16 sps:$4 sm:$0xff]  }
  0x2c   :  { %1317 = vmatpush2.bf16.msra.mxu1 %v4854_v43  ;;  %1277 = vmatprep.subr.bf16.mxu0 %v4855_v44  ;;  %v4932_v43 = vld [vmem:[%s7356_s2 + $0x2c] ss:$16 sps:$4 sm:$0xff]   ;;  %v4935_v44 = vld [vmem:[%s7356_s2 + $0x5e4] ss:$16 sps:$4 sm:$0xff]   ;;  %v4933_v46 = vld [vmem:[%s7356_s2 + $0x5e0] ss:$16 sps:$4 sm:$0xff]  }
  0x2d   :  { %1318 = vmatprep.subr.bf16.mxu1 %v4857_v45  ;;  %v4930_v45 = vld [vmem:[%s7356_s2 + $0x28] ss:$16 sps:$4 sm:$0xff]   ;;  %v4939_v50 = vld [vmem:[%s7356_s2 + $0x5c0] ss:$16 sps:$4 sm:$0xff]   ;;  %v4971_v5 = vld [vmem:[%s7356_s2 + $0x524] ss:$16 sps:$4 sm:$0xff]  }
  0x2e   :  { %v43_v15 = vld [vmem:[%s7354_s0 + $0x20] sm:$0xff] }
  0x2f   :  { %1278 = vmatpush2.bf16.msra.mxu0 %v4859_v47  ;;  %v4938_v47 = vld [vmem:[%s7356_s2 + $0xc] ss:$16 sps:$4 sm:$0xff]  }
  0x30   :  { %1319 = vmatpush2.bf16.msra.mxu1 %v4860_v48  ;;  %1279 = vmatprep.subr.bf16.mxu0 %v4861_v51  ;;  %v4941_v48 = vld [vmem:[%s7356_s2 + $0x5c4] ss:$16 sps:$4 sm:$0xff]   ;;  %v4944_v51 = vld [vmem:[%s7356_s2 + $0x1ec] ss:$16 sps:$4 sm:$0xff]  }
  0x31   :  { %1320 = vmatprep.subr.bf16.mxu1 %v4863_v53  ;;  %v4947_v53 = vld [vmem:[%s7356_s2 + $0x5a4] ss:$16 sps:$4 sm:$0xff]  }
  0x33   :  { %1280 = vmatpush2.bf16.msra.mxu0 %v4865_v54  ;;  %v4942_v54 = vld [vmem:[%s7356_s2 + $0x1e8] ss:$16 sps:$4 sm:$0xff]  }
  0x34   :  { %1321 = vmatpush2.bf16.msra.mxu1 %v4866_v55  ;;  %1281 = vmatprep.subr.bf16.mxu0 %v4867_v56  ;;  %v4945_v55 = vld [vmem:[%s7356_s2 + $0x5a0] ss:$16 sps:$4 sm:$0xff]   ;;  %v4950_v56 = vld [vmem:[%s7356_s2 + $0x1cc] ss:$16 sps:$4 sm:$0xff]  }
  0x35   :  { %1322 = vmatprep.subr.bf16.mxu1 %v4869_v57  ;;  %v4953_v57 = vld [vmem:[%s7356_s2 + $0x584] ss:$16 sps:$4 sm:$0xff]  }
  0x37   :  { %1282 = vmatpush2.bf16.msra.mxu0 %v4871_v58  ;;  %v4948_v58 = vld [vmem:[%s7356_s2 + $0x1c8] ss:$16 sps:$4 sm:$0xff]  }
  0x38   :  { %1323 = vmatpush2.bf16.msra.mxu1 %v4872_v59  ;;  %1283 = vmatprep.subr.bf16.mxu0 %v4873_v60  ;;  %v4951_v59 = vld [vmem:[%s7356_s2 + $0x580] ss:$16 sps:$4 sm:$0xff]   ;;  %v4956_v60 = vld [vmem:[%s7356_s2 + $0x1ac] ss:$16 sps:$4 sm:$0xff]  }
  0x39   :  { %1324 = vmatprep.subr.bf16.mxu1 %v4875_v61  ;;  %v4959_v61 = vld [vmem:[%s7356_s2 + $0x564] ss:$16 sps:$4 sm:$0xff]  }
  0x3b   :  { %1284 = vmatpush2.bf16.msra.mxu0 %v4877_v62  ;;  %v4954_v62 = vld [vmem:[%s7356_s2 + $0x1a8] ss:$16 sps:$4 sm:$0xff]  }
  0x3c   :  { %1325 = vmatpush2.bf16.msra.mxu1 %v4878_v63  ;;  %1285 = vmatprep.subr.bf16.mxu0 %v4879_v0  ;;  %v4957_v63 = vld [vmem:[%s7356_s2 + $0x560] ss:$16 sps:$4 sm:$0xff]   ;;  %v4962_v0 = vld [vmem:[%s7356_s2 + $0x18c] ss:$16 sps:$4 sm:$0xff]  }
  0x3d   :  { %1326 = vmatprep.subr.bf16.mxu1 %v4881_v1  ;;  %v4965_v1 = vld [vmem:[%s7356_s2 + $0x544] ss:$16 sps:$4 sm:$0xff]  }
  0x3f   :  { %1286 = vmatpush2.bf16.msra.mxu0 %v4883_v2  ;;  %v4960_v2 = vld [vmem:[%s7356_s2 + $0x188] ss:$16 sps:$4 sm:$0xff]  }
  0x40   :  { %1327 = vmatpush2.bf16.msra.mxu1 %v4884_v3  ;;  %1337 = vmatprep.subr.bf16.mxu0 %v4887_v6  ;;  %v4963_v3 = vld [vmem:[%s7356_s2 + $0x540] ss:$16 sps:$4 sm:$0xff]   ;;  %v4966_v6 = vld [vmem:[%s7356_s2 + $0x168] ss:$16 sps:$4 sm:$0xff]  }
  0x41   :  { %1392 = vmatprep.subr.bf16.mxu1 %v4890_v7  ;;  %v4969_v7 = vld [vmem:[%s7356_s2 + $0x520] ss:$16 sps:$4 sm:$0xff]  }
  0x42   :  { %1288 = vmatmul.mubr.bf16.vlgmr.msra.gmra.mxu0 %v5875_v8 }
  0x43   :  { %1329 = vmatmul.mubr.bf16.vlgmr.msra.gmra.mxu1 %v5877_v9  ;;  %1338 = vmatpush1.bf16.msra.mxu0 %v4885_v10  ;;  %v4974_v10 = vld [vmem:[%s7356_s2 + $0x14c] ss:$16 sps:$4 sm:$0xff]  }
  0x44   :  { %1393 = vmatpush1.bf16.msra.mxu1 %v4888_v11  ;;  %1339 = vmatprep.subr.bf16.mxu0 %v4893_v12  ;;  %v4977_v11 = vld [vmem:[%s7356_s2 + $0x504] ss:$16 sps:$4 sm:$0xff]   ;;  %v4972_v12 = vld [vmem:[%s7356_s2 + $0x148] ss:$16 sps:$4 sm:$0xff]  }
  0x45   :  { %1410 = vmatprep.mubr.bf16.mxu1 %v5597_v16  ;;  %1419 = vmatprep.subr.bf16.mxu1 %v4896_v13  ;;  %v4975_v13 = vld [vmem:[%s7356_s2 + $0x500] ss:$16 sps:$4 sm:$0xff]  }
  0x46   :  { %1369 = vmatprep.mubr.bf16.mxu0 %v5959_v36 }
  0x47   :  { %1340 = vmatpush1.bf16.msra.mxu0 %v4891_v14  ;;  %v4980_v14 = vld [vmem:[%s7356_s2 + $0x12c] ss:$16 sps:$4 sm:$0xff]  }
  0x48   :  { %1341 = vmatprep.subr.bf16.mxu0 %v4899_v17  ;;  %v4983_v17 = vld [vmem:[%s7356_s2 + $0x2ec] ss:$16 sps:$4 sm:$0xff]  }
  0x4b   :  { %4414 = vmatmul.mubr.msk.bf16.vlgmr.msra.gmra.mxu1 %vm1251_vm0, %v5906_v19  ;;  %1342 = vmatpush1.bf16.msra.mxu0 %v4897_v20  ;;  %v6088_v20 = vpack.c.bf16 %v43_v15, %v43_v15  ;;  %v5070_v15 = vld [vmem:[%s7356_s2 + $0x54c] ss:$16 sps:$4 sm:$0xff]  }
  0x4c   :  { %1420 = vmatpush1.bf16.msra.mxu1 %v4894_v18  ;;  %1343 = vmatprep.subr.bf16.mxu0 %v4905_v22  ;;  %v4978_v18 = vld [vmem:[%s7356_s2 + $0x128] ss:$16 sps:$4 sm:$0xff]   ;;  %v4986_v22 = vld [vmem:[%s7356_s2 + $0x10c] ss:$16 sps:$4 sm:$0xff]  }
  0x4d   :  { %1421 = vmatprep.subr.bf16.mxu1 %v4902_v21  ;;  %1451 = vmatprep.mubr.bf16.mxu1 %v5806_v49  ;;  %v4936_v49 = vld [vmem:[%s7356_s2 + $0x8] ss:$16 sps:$4 sm:$0xff]  }
  0x4e   :  { %v4981_v21 = vld [vmem:[%s7356_s2 + $0x2e8] ss:$16 sps:$4 sm:$0xff]  }
  0x4f   :  { %1344 = vmatpush1.bf16.msra.mxu0 %v4903_v24  ;;  %v4984_v24 = vld [vmem:[%s7356_s2 + $0x108] ss:$16 sps:$4 sm:$0xff]  }
  0x50   :  { %1422 = vmatpush1.bf16.msra.mxu1 %v4900_v23  ;;  %1345 = vmatprep.subr.bf16.mxu0 %v4911_v26  ;;  %v4989_v23 = vld [vmem:[%s7356_s2 + $0x2cc] ss:$16 sps:$4 sm:$0xff]  }
  0x51   :  { %1423 = vmatprep.subr.bf16.mxu1 %v4908_v25  ;;  %v4987_v25 = vld [vmem:[%s7356_s2 + $0x2c8] ss:$16 sps:$4 sm:$0xff]   ;;  %v4992_v26 = vld [vmem:[%s7356_s2 + $0x4ec] ss:$16 sps:$4 sm:$0xff]  }
  0x53   :  { %1346 = vmatpush1.bf16.msra.mxu0 %v4909_v28  ;;  %v4990_v28 = vld [vmem:[%s7356_s2 + $0x4e8] ss:$16 sps:$4 sm:$0xff]  }
  0x54   :  { %1424 = vmatpush1.bf16.msra.mxu1 %v4906_v27  ;;  %1347 = vmatprep.subr.bf16.mxu0 %v4917_v30  ;;  %v4995_v27 = vld [vmem:[%s7356_s2 + $0x2ac] ss:$16 sps:$4 sm:$0xff]  }
  0x55   :  { %1425 = vmatprep.subr.bf16.mxu1 %v4914_v29  ;;  %v4993_v29 = vld [vmem:[%s7356_s2 + $0x2a8] ss:$16 sps:$4 sm:$0xff]   ;;  %v4998_v30 = vld [vmem:[%s7356_s2 + $0x4cc] ss:$16 sps:$4 sm:$0xff]  }
  0x57   :  { %1348 = vmatpush1.bf16.msra.mxu0 %v4915_v32  ;;  %v4996_v32 = vld [vmem:[%s7356_s2 + $0x4c8] ss:$16 sps:$4 sm:$0xff]  }
  0x58   :  { %1426 = vmatpush1.bf16.msra.mxu1 %v4912_v31  ;;  %1349 = vmatprep.subr.bf16.mxu0 %v4923_v34  ;;  %v5001_v31 = vld [vmem:[%s7356_s2 + $0x28c] ss:$16 sps:$4 sm:$0xff]  }
  0x59   :  { %1427 = vmatprep.subr.bf16.mxu1 %v4920_v33  ;;  %v5004_v33 = vld [vmem:[%s7356_s2 + $0x4ac] ss:$16 sps:$4 sm:$0xff]  }
  0x5a   :  { %v5007_v34 = vld [vmem:[%s7356_s2 + $0x26c] ss:$16 sps:$4 sm:$0xff]  }
  0x5b   :  { %1350 = vmatpush1.bf16.msra.mxu0 %v4921_v38  ;;  %v5013_v38 = vld [vmem:[%s7356_s2 + $0x24c] ss:$16 sps:$4 sm:$0xff]  }
  0x5c   :  { %1428 = vmatpush1.bf16.msra.mxu1 %v4918_v37  ;;  %1351 = vmatprep.subr.bf16.mxu0 %v4929_v40  ;;  %v5010_v37 = vld [vmem:[%s7356_s2 + $0x48c] ss:$16 sps:$4 sm:$0xff]  }
  0x5d   :  { %1429 = vmatprep.subr.bf16.mxu1 %v4926_v39  ;;  %v5011_v39 = vld [vmem:[%s7356_s2 + $0x248] ss:$16 sps:$4 sm:$0xff]   ;;  %v5016_v40 = vld [vmem:[%s7356_s2 + $0x46c] ss:$16 sps:$4 sm:$0xff]  }
  0x5f   :  { %1352 = vmatpush1.bf16.msra.mxu0 %v4927_v42  ;;  %v5014_v42 = vld [vmem:[%s7356_s2 + $0x468] ss:$16 sps:$4 sm:$0xff]  }
  0x60   :  { %1430 = vmatpush1.bf16.msra.mxu1 %v4924_v41  ;;  %1353 = vmatprep.subr.bf16.mxu0 %v4935_v44  ;;  %v5019_v41 = vld [vmem:[%s7356_s2 + $0x22c] ss:$16 sps:$4 sm:$0xff]  }
  0x61   :  { %1431 = vmatprep.subr.bf16.mxu1 %v4932_v43  ;;  %v5017_v43 = vld [vmem:[%s7356_s2 + $0x228] ss:$16 sps:$4 sm:$0xff]   ;;  %v5022_v44 = vld [vmem:[%s7356_s2 + $0x44c] ss:$16 sps:$4 sm:$0xff]  }
  0x63   :  { %1354 = vmatpush2.bf16.msra.mxu0 %v4933_v46  ;;  %v5020_v46 = vld [vmem:[%s7356_s2 + $0x448] ss:$16 sps:$4 sm:$0xff]  }
  0x64   :  { %1432 = vmatpush1.bf16.msra.mxu1 %v4930_v45  ;;  %1355 = vmatprep.subr.bf16.mxu0 %v4941_v48  ;;  %v5025_v45 = vld [vmem:[%s7356_s2 + $0x20c] ss:$16 sps:$4 sm:$0xff]  }
  0x65   :  { %1433 = vmatprep.subr.bf16.mxu1 %v4938_v47  ;;  %v5023_v47 = vld [vmem:[%s7356_s2 + $0x208] ss:$16 sps:$4 sm:$0xff]   ;;  %v5028_v48 = vld [vmem:[%s7356_s2 + $0x42c] ss:$16 sps:$4 sm:$0xff]  }
  0x67   :  { %1356 = vmatpush2.bf16.msra.mxu0 %v4939_v50  ;;  %v5026_v50 = vld [vmem:[%s7356_s2 + $0x428] ss:$16 sps:$4 sm:$0xff]  }
  0x68   :  { %1434 = vmatpush1.bf16.msra.mxu1 %v4936_v49  ;;  %1357 = vmatprep.subr.bf16.mxu0 %v4947_v53  ;;  %v5031_v49 = vld [vmem:[%s7356_s2 + $0x3ec] ss:$16 sps:$4 sm:$0xff]  }
  0x69   :  { %1435 = vmatprep.subr.bf16.mxu1 %v4944_v51  ;;  %v5029_v51 = vld [vmem:[%s7356_s2 + $0x3e8] ss:$16 sps:$4 sm:$0xff]   ;;  %v5034_v53 = vld [vmem:[%s7356_s2 + $0x40c] ss:$16 sps:$4 sm:$0xff]  }
  0x6b   :  { %1358 = vmatpush2.bf16.msra.mxu0 %v4945_v55  ;;  %v5032_v55 = vld [vmem:[%s7356_s2 + $0x408] ss:$16 sps:$4 sm:$0xff]  }
  0x6c   :  { %1436 = vmatpush2.bf16.msra.mxu1 %v4942_v54  ;;  %1359 = vmatprep.subr.bf16.mxu0 %v4953_v57  ;;  %v5037_v54 = vld [vmem:[%s7356_s2 + $0x3cc] ss:$16 sps:$4 sm:$0xff]  }
  0x6d   :  { %1437 = vmatprep.subr.bf16.mxu1 %v4950_v56  ;;  %v5035_v56 = vld [vmem:[%s7356_s2 + $0x3c8] ss:$16 sps:$4 sm:$0xff]   ;;  %v5040_v57 = vld [vmem:[%s7356_s2 + $0x5ec] ss:$16 sps:$4 sm:$0xff]  }
  0x6f   :  { %1360 = vmatpush2.bf16.msra.mxu0 %v4951_v59  ;;  %v5038_v59 = vld [vmem:[%s7356_s2 + $0x5e8] ss:$16 sps:$4 sm:$0xff]  }
  0x70   :  { %1438 = vmatpush2.bf16.msra.mxu1 %v4948_v58  ;;  %1361 = vmatprep.subr.bf16.mxu0 %v4959_v61  ;;  %v5043_v58 = vld [vmem:[%s7356_s2 + $0x3ac] ss:$16 sps:$4 sm:$0xff]  }
  0x71   :  { %1439 = vmatprep.subr.bf16.mxu1 %v4956_v60  ;;  %v5041_v60 = vld [vmem:[%s7356_s2 + $0x3a8] ss:$16 sps:$4 sm:$0xff]   ;;  %v5046_v61 = vld [vmem:[%s7356_s2 + $0x5cc] ss:$16 sps:$4 sm:$0xff]  }
  0x73   :  { %1362 = vmatpush2.bf16.msra.mxu0 %v4957_v63  ;;  %v5044_v63 = vld [vmem:[%s7356_s2 + $0x5c8] ss:$16 sps:$4 sm:$0xff]  }
  0x74   :  { %1440 = vmatpush2.bf16.msra.mxu1 %v4954_v62  ;;  %1363 = vmatprep.subr.bf16.mxu0 %v4965_v1  ;;  %v5049_v62 = vld [vmem:[%s7356_s2 + $0x38c] ss:$16 sps:$4 sm:$0xff]  }
  0x75   :  { %1441 = vmatprep.subr.bf16.mxu1 %v4962_v0  ;;  %v5047_v0 = vld [vmem:[%s7356_s2 + $0x388] ss:$16 sps:$4 sm:$0xff]   ;;  %v5052_v1 = vld [vmem:[%s7356_s2 + $0x5ac] ss:$16 sps:$4 sm:$0xff]  }
  0x77   :  { %1364 = vmatpush2.bf16.msra.mxu0 %v4963_v3  ;;  %v5050_v3 = vld [vmem:[%s7356_s2 + $0x5a8] ss:$16 sps:$4 sm:$0xff]  }
  0x78   :  { %1442 = vmatpush2.bf16.msra.mxu1 %v4960_v2  ;;  %1365 = vmatprep.subr.bf16.mxu0 %v4971_v5  ;;  %v5055_v2 = vld [vmem:[%s7356_s2 + $0x36c] ss:$16 sps:$4 sm:$0xff]  }
  0x79   :  { %1443 = vmatprep.subr.bf16.mxu1 %v4968_v4  ;;  %v5053_v4 = vld [vmem:[%s7356_s2 + $0x368] ss:$16 sps:$4 sm:$0xff]   ;;  %v5058_v5 = vld [vmem:[%s7356_s2 + $0x58c] ss:$16 sps:$4 sm:$0xff]  }
  0x7b   :  { %1366 = vmatpush2.bf16.msra.mxu0 %v4969_v7  ;;  %v5056_v7 = vld [vmem:[%s7356_s2 + $0x588] ss:$16 sps:$4 sm:$0xff]  }
  0x7c   :  { %1444 = vmatpush2.bf16.msra.mxu1 %v4966_v6  ;;  %1367 = vmatprep.subr.bf16.mxu0 %v4977_v11  ;;  %v5061_v6 = vld [vmem:[%s7356_s2 + $0x34c] ss:$16 sps:$4 sm:$0xff]  }
  0x7d   :  { %1445 = vmatprep.subr.bf16.mxu1 %v4974_v10  ;;  %v5059_v10 = vld [vmem:[%s7356_s2 + $0x348] ss:$16 sps:$4 sm:$0xff]   ;;  %v5064_v11 = vld [vmem:[%s7356_s2 + $0x56c] ss:$16 sps:$4 sm:$0xff]  }
  0x7f   :  { %1368 = vmatpush2.bf16.msra.mxu0 %v4975_v13  ;;  %v5062_v13 = vld [vmem:[%s7356_s2 + $0x568] ss:$16 sps:$4 sm:$0xff]  }
  0x80   :  { %1446 = vmatpush2.bf16.msra.mxu1 %v4972_v12  ;;  %1460 = vmatprep.subr.bf16.mxu0 %v4983_v17  ;;  %v5067_v12 = vld [vmem:[%s7356_s2 + $0x32c] ss:$16 sps:$4 sm:$0xff]  }
  0x81   :  { %1447 = vmatprep.subr.bf16.mxu1 %v4980_v14  ;;  %v5065_v14 = vld [vmem:[%s7356_s2 + $0x328] ss:$16 sps:$4 sm:$0xff]   ;;  %v5073_v17 = vld [vmem:[%s7356_s2 + $0x30c] ss:$16 sps:$4 sm:$0xff]  }
  0x82   :  { %1370 = vmatmul.mubr.bf16.vlgmr.msra.gmra.mxu0 %v6088_v20 }
  0x83   :  { %1461 = vmatpush1.bf16.msra.mxu0 %v4981_v21  ;;  %1492 = vmatprep.mubr.bf16.mxu0 %v5814_v52  ;;  %v4999_v52 = vld [vmem:[%s7356_s2 + $0x288] ss:$16 sps:$4 sm:$0xff]  }
  0x84   :  { %1448 = vmatpush2.bf16.msra.mxu1 %v4978_v18  ;;  %1462 = vmatprep.subr.bf16.mxu0 %v4989_v23  ;;  %v5068_v18 = vld [vmem:[%s7356_s2 + $0x548] ss:$16 sps:$4 sm:$0xff]   ;;  %v5079_v23 = vld [vmem:[%s7356_s2 + $0x60c] ss:$16 sps:$4 sm:$0xff]  }
  0x85   :  { %1449 = vmatprep.subr.bf16.mxu1 %v4986_v22  ;;  %v5071_v21 = vld [vmem:[%s7356_s2 + $0x308] ss:$16 sps:$4 sm:$0xff]   ;;  %v5076_v22 = vld [vmem:[%s7356_s2 + $0x52c] ss:$16 sps:$4 sm:$0xff]  }
  0x87   :  { %1463 = vmatpush1.bf16.msra.mxu0 %v4987_v25  ;;  %v5077_v25 = vld [vmem:[%s7356_s2 + $0x608] ss:$16 sps:$4 sm:$0xff]  }
  0x88   :  { %1450 = vmatpush2.bf16.msra.mxu1 %v4984_v24  ;;  %1464 = vmatprep.subr.bf16.mxu0 %v4995_v27  ;;  %v5074_v24 = vld [vmem:[%s7356_s2 + $0x528] ss:$16 sps:$4 sm:$0xff]   ;;  %v5085_v27 = vld [vmem:[%s7358_s4 + $0x74] ss:$8 sps:$4 sm:$0xff]  }
  0x89   :  { %1501 = vmatprep.subr.bf16.mxu1 %v4992_v26  ;;  %v5082_v26 = vld [vmem:[%s7356_s2 + $0x50c] ss:$16 sps:$4 sm:$0xff]  }
  0x8b   :  { %1452 = vmatmul.mubr.bf16.vlgmr.msra.gmra.mxu1 %v5875_v8  ;;  %1465 = vmatpush1.bf16.msra.mxu0 %v4993_v29  ;;  %v5005_v8 = vld [vmem:[%s7356_s2 + $0x268] ss:$16 sps:$4 sm:$0xff]  }
  0x8c   :  { %1502 = vmatpush1.bf16.msra.mxu1 %v4990_v28  ;;  %1466 = vmatprep.subr.bf16.mxu0 %v5001_v31  ;;  %v5080_v28 = vld [vmem:[%s7356_s2 + $0x508] ss:$16 sps:$4 sm:$0xff]   ;;  %v5091_v31 = vld [vmem:[%s7358_s4 + $0x54] ss:$8 sps:$4 sm:$0xff]  }
  0x8d   :  { %1503 = vmatprep.subr.bf16.mxu1 %v4998_v30  ;;  %1533 = vmatprep.mubr.bf16.mxu1 %v5959_v36  ;;  %v5008_v36 = vld [vmem:[%s7356_s2 + $0x488] ss:$16 sps:$4 sm:$0xff]   ;;  %v5088_v30 = vld [vmem:[%s7358_s4 + $0x64] ss:$8 sps:$4 sm:$0xff]  }
  0x8e   :  { %v5083_v29 = vld [vmem:[%s7358_s4 + $0x70] ss:$8 sps:$4 sm:$0xff]  }
  0x8f   :  { %1467 = vmatpush1.bf16.msra.mxu0 %v4999_v52  ;;  %v5094_v52 = vld [vmem:[%s7358_s4 + $0x44] ss:$8 sps:$4 sm:$0xff]  }
  0x90   :  { %1504 = vmatpush1.bf16.msra.mxu1 %v4996_v32  ;;  %1468 = vmatprep.subr.bf16.mxu0 %v5007_v34  ;;  %v5089_v32 = vld [vmem:[%s7358_s4 + $0x50] ss:$8 sps:$4 sm:$0xff]   ;;  %v5092_v34 = vld [vmem:[%s7358_s4 + $0x40] ss:$8 sps:$4 sm:$0xff]  }
  0x91   :  { %1505 = vmatprep.subr.bf16.mxu1 %v5004_v33  ;;  %v5136_v33 = vld [vmem:[%s7358_s4 + $0x164] ss:$8 sps:$4 sm:$0xff]  }
  0x93   :  { %1469 = vmatpush1.bf16.msra.mxu0 %v5005_v8  ;;  %v5097_v8 = vld [vmem:[%s7358_s4 + $0x34] ss:$8 sps:$4 sm:$0xff]  }
  0x94   :  { %1506 = vmatpush1.bf16.msra.mxu1 %v5002_v35  ;;  %1470 = vmatprep.subr.bf16.mxu0 %v5013_v38  ;;  %v5134_v35 = vld [vmem:[%s7358_s4 + $0x160] ss:$8 sps:$4 sm:$0xff]   ;;  %v5095_v38 = vld [vmem:[%s7358_s4 + $0x30] ss:$8 sps:$4 sm:$0xff]  }
  0x95   :  { %1507 = vmatprep.subr.bf16.mxu1 %v5010_v37  ;;  %v5139_v37 = vld [vmem:[%s7358_s4 + $0x154] ss:$8 sps:$4 sm:$0xff]  }
  0x97   :  { %1471 = vmatpush1.bf16.msra.mxu0 %v5011_v39  ;;  %v5137_v39 = vld [vmem:[%s7358_s4 + $0x150] ss:$8 sps:$4 sm:$0xff]  }
  0x98   :  { %1508 = vmatpush1.bf16.msra.mxu1 %v5008_v36  ;;  %1472 = vmatprep.subr.bf16.mxu0 %v5019_v41  ;;  %v5100_v36 = vld [vmem:[%s7358_s4 + $0x24] ss:$8 sps:$4 sm:$0xff]   ;;  %v5098_v41 = vld [vmem:[%s7358_s4 + $0x20] ss:$8 sps:$4 sm:$0xff]  }
  0x99   :  { %1509 = vmatprep.subr.bf16.mxu1 %v5016_v40  ;;  %v5142_v40 = vld [vmem:[%s7358_s4 + $0x144] ss:$8 sps:$4 sm:$0xff]  }
  0x9b   :  { %1473 = vmatpush1.bf16.msra.mxu0 %v5017_v43  ;;  %v5103_v43 = vld [vmem:[%s7358_s4 + $0x14] ss:$8 sps:$4 sm:$0xff]  }
  0x9c   :  { %1510 = vmatpush1.bf16.msra.mxu1 %v5014_v42  ;;  %1474 = vmatprep.subr.bf16.mxu0 %v5025_v45  ;;  %v5140_v42 = vld [vmem:[%s7358_s4 + $0x140] ss:$8 sps:$4 sm:$0xff]   ;;  %v5101_v45 = vld [vmem:[%s7358_s4 + $0x10] ss:$8 sps:$4 sm:$0xff]  }
  0x9d   :  { %1511 = vmatprep.subr.bf16.mxu1 %v5022_v44  ;;  %v5145_v44 = vld [vmem:[%s7358_s4 + $0x134] ss:$8 sps:$4 sm:$0xff]  }
  0x9f   :  { %1475 = vmatpush1.bf16.msra.mxu0 %v5023_v47  ;;  %v5106_v47 = vld [vmem:[%s7358_s4 + $0x4] ss:$8 sps:$4 sm:$0xff]  }
  0xa0   :  { %1512 = vmatpush1.bf16.msra.mxu1 %v5020_v46  ;;  %1476 = vmatprep.subr.bf16.mxu0 %v5031_v49  ;;  %v5143_v46 = vld [vmem:[%s7358_s4 + $0x130] ss:$8 sps:$4 sm:$0xff]   ;;  %v5104_v49 = vld [vmem:[%s7358_s4] ss:$8 sps:$4 sm:$0xff]  }
  0xa1   :  { %1513 = vmatprep.subr.bf16.mxu1 %v5028_v48  ;;  %v5148_v48 = vld [vmem:[%s7358_s4 + $0x124] ss:$8 sps:$4 sm:$0xff]  }
  0xa3   :  { %1477 = vmatpush2.bf16.msra.mxu0 %v5029_v51  ;;  %v5109_v51 = vld [vmem:[%s7358_s4 + $0xf4] ss:$8 sps:$4 sm:$0xff]  }
  0xa4   :  { %1514 = vmatpush1.bf16.msra.mxu1 %v5026_v50  ;;  %1478 = vmatprep.subr.bf16.mxu0 %v5037_v54  ;;  %v5146_v50 = vld [vmem:[%s7358_s4 + $0x120] ss:$8 sps:$4 sm:$0xff]   ;;  %v5107_v54 = vld [vmem:[%s7358_s4 + $0xf0] ss:$8 sps:$4 sm:$0xff]  }
  0xa5   :  { %1515 = vmatprep.subr.bf16.mxu1 %v5034_v53  ;;  %v5151_v53 = vld [vmem:[%s7358_s4 + $0x114] ss:$8 sps:$4 sm:$0xff]  }
  0xa7   :  { %1479 = vmatpush2.bf16.msra.mxu0 %v5035_v56  ;;  %v5112_v56 = vld [vmem:[%s7358_s4 + $0xe4] ss:$8 sps:$4 sm:$0xff]  }
  0xa8   :  { %1516 = vmatpush1.bf16.msra.mxu1 %v5032_v55  ;;  %1480 = vmatprep.subr.bf16.mxu0 %v5043_v58  ;;  %v5149_v55 = vld [vmem:[%s7358_s4 + $0x110] ss:$8 sps:$4 sm:$0xff]   ;;  %v5110_v58 = vld [vmem:[%s7358_s4 + $0xe0] ss:$8 sps:$4 sm:$0xff]  }
  0xa9   :  { %1517 = vmatprep.subr.bf16.mxu1 %v5040_v57  ;;  %v5154_v57 = vld [vmem:[%s7358_s4 + $0x104] ss:$8 sps:$4 sm:$0xff]  }
  0xab   :  { %1481 = vmatpush2.bf16.msra.mxu0 %v5041_v60  ;;  %v5115_v60 = vld [vmem:[%s7358_s4 + $0xd4] ss:$8 sps:$4 sm:$0xff]  }
  0xac   :  { %1518 = vmatpush2.bf16.msra.mxu1 %v5038_v59  ;;  %1482 = vmatprep.subr.bf16.mxu0 %v5049_v62  ;;  %v5152_v59 = vld [vmem:[%s7358_s4 + $0x100] ss:$8 sps:$4 sm:$0xff]   ;;  %v5113_v62 = vld [vmem:[%s7358_s4 + $0xd0] ss:$8 sps:$4 sm:$0xff]  }
  0xad   :  { %1519 = vmatprep.subr.bf16.mxu1 %v5046_v61  ;;  %v5157_v61 = vld [vmem:[%s7358_s4 + $0x1f4] ss:$8 sps:$4 sm:$0xff]  }
  0xaf   :  { %1483 = vmatpush2.bf16.msra.mxu0 %v5047_v0  ;;  %v5118_v0 = vld [vmem:[%s7358_s4 + $0xc4] ss:$8 sps:$4 sm:$0xff]  }
  0xb0   :  { %1520 = vmatpush2.bf16.msra.mxu1 %v5044_v63  ;;  %1484 = vmatprep.subr.bf16.mxu0 %v5055_v2  ;;  %v5155_v63 = vld [vmem:[%s7358_s4 + $0x1f0] ss:$8 sps:$4 sm:$0xff]   ;;  %v5116_v2 = vld [vmem:[%s7358_s4 + $0xc0] ss:$8 sps:$4 sm:$0xff]  }
  0xb1   :  { %1521 = vmatprep.subr.bf16.mxu1 %v5052_v1  ;;  %v5160_v1 = vld [vmem:[%s7358_s4 + $0x1e4] ss:$8 sps:$4 sm:$0xff]  }
  0xb3   :  { %1485 = vmatpush2.bf16.msra.mxu0 %v5053_v4  ;;  %v5121_v4 = vld [vmem:[%s7358_s4 + $0xb4] ss:$8 sps:$4 sm:$0xff]  }
  0xb4   :  { %1522 = vmatpush2.bf16.msra.mxu1 %v5050_v3  ;;  %1486 = vmatprep.subr.bf16.mxu0 %v5061_v6  ;;  %v5158_v3 = vld [vmem:[%s7358_s4 + $0x1e0] ss:$8 sps:$4 sm:$0xff]   ;;  %v5119_v6 = vld [vmem:[%s7358_s4 + $0xb0] ss:$8 sps:$4 sm:$0xff]  }
  0xb5   :  { %1523 = vmatprep.subr.bf16.mxu1 %v5058_v5  ;;  %v5163_v5 = vld [vmem:[%s7358_s4 + $0x1d4] ss:$8 sps:$4 sm:$0xff]  }
  0xb7   :  { %1487 = vmatpush2.bf16.msra.mxu0 %v5059_v10  ;;  %v5124_v10 = vld [vmem:[%s7358_s4 + $0xa4] ss:$8 sps:$4 sm:$0xff]  }
  0xb8   :  { %1524 = vmatpush2.bf16.msra.mxu1 %v5056_v7  ;;  %1488 = vmatprep.subr.bf16.mxu0 %v5067_v12  ;;  %v5161_v7 = vld [vmem:[%s7358_s4 + $0x1d0] ss:$8 sps:$4 sm:$0xff]   ;;  %v5122_v12 = vld [vmem:[%s7358_s4 + $0xa0] ss:$8 sps:$4 sm:$0xff]  }
  0xb9   :  { %1525 = vmatprep.subr.bf16.mxu1 %v5064_v11  ;;  %v5166_v11 = vld [vmem:[%s7358_s4 + $0x1c4] ss:$8 sps:$4 sm:$0xff]  }
  0xbb   :  { %1489 = vmatpush2.bf16.msra.mxu0 %v5065_v14  ;;  %v5127_v14 = vld [vmem:[%s7358_s4 + $0x94] ss:$8 sps:$4 sm:$0xff]  }
  0xbc   :  { %1526 = vmatpush2.bf16.msra.mxu1 %v5062_v13  ;;  %1490 = vmatprep.subr.bf16.mxu0 %v5073_v17  ;;  %v5164_v13 = vld [vmem:[%s7358_s4 + $0x1c0] ss:$8 sps:$4 sm:$0xff]   ;;  %v5130_v17 = vld [vmem:[%s7358_s4 + $0x84] ss:$8 sps:$4 sm:$0xff]  }
  0xbd   :  { %1527 = vmatprep.subr.bf16.mxu1 %v5070_v15  ;;  %v5125_v15 = vld [vmem:[%s7358_s4 + $0x90] ss:$8 sps:$4 sm:$0xff]  }
  0xbf   :  { %1491 = vmatpush2.bf16.msra.mxu0 %v5071_v21 }
  0xc0   :  { %1528 = vmatpush2.bf16.msra.mxu1 %v5068_v18  ;;  %1556 = vmatprep.subr.bf16.mxu0 %v5079_v23  ;;  %v5128_v18 = vld [vmem:[%s7358_s4 + $0x80] ss:$8 sps:$4 sm:$0xff]  }
  0xc1   :  { %1529 = vmatprep.subr.bf16.mxu1 %v5076_v22 }
  0xc2   :  { %1493 = vmatmul.mubr.bf16.vlgmr.msra.gmra.mxu0 %v5877_v9  ;;  %v5086_v9 = vld [vmem:[%s7358_s4 + $0x60] ss:$8 sps:$4 sm:$0xff]  }
  0xc3   :  { %1557 = vmatpush1.bf16.msra.mxu0 %v5077_v25  ;;  %1574 = vmatprep.mubr.bf16.mxu0 %v5597_v16  ;;  %v5169_v25 = vld [vmem:[%s7358_s4 + $0x1b4] ss:$8 sps:$4 sm:$0xff]  }
  0xc4   :  { %1530 = vmatpush2.bf16.msra.mxu1 %v5074_v24  ;;  %1987 = vmatprep.subr.bf16.mxu0 %v5085_v27 }
  0xc5   :  { %1531 = vmatprep.subr.bf16.mxu1 %v5082_v26  ;;  %v5167_v26 = vld [vmem:[%s7358_s4 + $0x1b0] ss:$8 sps:$4 sm:$0xff]  }
  0xc8   :  { %1532 = vmatpush2.bf16.msra.mxu1 %v5080_v28 }
  0xca   :  { %4415 = vmatmul.mubr.msk.bf16.vlgmr.msra.gmra.mxu0 %vm1251_vm0, %v5906_v19  ;;  %v5131_v19 = vld [vmem:[%s7358_s4 + $0x170] ss:$8 sps:$4 sm:$0xff]  }
  0xcb   :  { %1534 = vmatmul.mubr.bf16.vlgmr.msra.gmra.mxu1 %v6088_v20  ;;  %1988 = vmatpush1.bf16.msra.mxu0 %v5083_v29  ;;  %v5133_v20 = vld [vmem:[%s7358_s4 + $0x174] ss:$8 sps:$4 sm:$0xff]  }
  0xcc   :  { %1989 = vmatprep.subr.bf16.mxu0 %v5088_v30  ;;  %2028 = vmatprep.subr.bf16.mxu1 %v5133_v20  ;;  %v5173_v20 = vld [vmem:[%s7358_s4 + $0x190] ss:$8 sps:$4 sm:$0xff]  }
  0xcd   :  { %2029 = vmatpush1.bf16.msra.mxu1 %v5131_v19  ;;  %v5175_v19 = vld [vmem:[%s7358_s4 + $0x194] ss:$8 sps:$4 sm:$0xff]  }
  0xce   :  { %2030 = vmatprep.subr.bf16.mxu1 %v5136_v33 }
  0xcf   :  { %1990 = vmatpush1.bf16.msra.mxu0 %v5086_v9  ;;  %v5172_v9 = vld [vmem:[%s7358_s4 + $0x1a4] ss:$8 sps:$4 sm:$0xff]  }
  0xd0   :  { %1991 = vmatprep.subr.bf16.mxu0 %v5091_v31  ;;  %v5170_v31 = vld [vmem:[%s7358_s4 + $0x1a0] ss:$8 sps:$4 sm:$0xff]  }
  0xd1   :  { %2031 = vmatpush1.bf16.msra.mxu1 %v5134_v35 }
  0xd2   :  { %2032 = vmatprep.subr.bf16.mxu1 %v5139_v37 }
  0xd3   :  { %1992 = vmatpush1.bf16.msra.mxu0 %v5089_v32 }
  0xd4   :  { %1993 = vmatprep.subr.bf16.mxu0 %v5094_v52 }
  0xd5   :  { %2033 = vmatpush1.bf16.msra.mxu1 %v5137_v39 }
  0xd6   :  { %2034 = vmatprep.subr.bf16.mxu1 %v5142_v40 }
  0xd7   :  { %1994 = vmatpush1.bf16.msra.mxu0 %v5092_v34 }
  0xd8   :  { %1995 = vmatprep.subr.bf16.mxu0 %v5097_v8 }
  0xd9   :  { %2035 = vmatpush1.bf16.msra.mxu1 %v5140_v42 }
  0xda   :  { %2036 = vmatprep.subr.bf16.mxu1 %v5145_v44 }
  0xdb   :  { %1996 = vmatpush1.bf16.msra.mxu0 %v5095_v38 }
  0xdc   :  { %1997 = vmatprep.subr.bf16.mxu0 %v5100_v36 }
  0xdd   :  { %2037 = vmatpush1.bf16.msra.mxu1 %v5143_v46 }
  0xde   :  { %2038 = vmatprep.subr.bf16.mxu1 %v5148_v48 }
  0xdf   :  { %1998 = vmatpush1.bf16.msra.mxu0 %v5098_v41 }
  0xe0   :  { %1999 = vmatprep.subr.bf16.mxu0 %v5103_v43 }
  0xe1   :  { %2039 = vmatpush1.bf16.msra.mxu1 %v5146_v50 }
  0xe2   :  { %2040 = vmatprep.subr.bf16.mxu1 %v5151_v53 }
  0xe3   :  { %2000 = vmatpush1.bf16.msra.mxu0 %v5101_v45 }
  0xe4   :  { %2001 = vmatprep.subr.bf16.mxu0 %v5106_v47 }
  0xe5   :  { %2041 = vmatpush1.bf16.msra.mxu1 %v5149_v55 }
  0xe6   :  { %2042 = vmatprep.subr.bf16.mxu1 %v5154_v57 }
  0xe7   :  { %2002 = vmatpush1.bf16.msra.mxu0 %v5104_v49 }
  0xe8   :  { %2003 = vmatprep.subr.bf16.mxu0 %v5109_v51 }
  0xe9   :  { %2043 = vmatpush1.bf16.msra.mxu1 %v5152_v59 }
  0xea   :  { %2044 = vmatprep.subr.bf16.mxu1 %v5157_v61 }
  0xeb   :  { %2004 = vmatpush2.bf16.msra.mxu0 %v5107_v54 }
  0xec   :  { %2005 = vmatprep.subr.bf16.mxu0 %v5112_v56 }
  0xed   :  { %2045 = vmatpush2.bf16.msra.mxu1 %v5155_v63 }
  0xee   :  { %2046 = vmatprep.subr.bf16.mxu1 %v5160_v1 }
  0xef   :  { %2006 = vmatpush2.bf16.msra.mxu0 %v5110_v58 }
  0xf0   :  { %2007 = vmatprep.subr.bf16.mxu0 %v5115_v60 }
  0xf1   :  { %2047 = vmatpush2.bf16.msra.mxu1 %v5158_v3 }
  0xf2   :  { %2048 = vmatprep.subr.bf16.mxu1 %v5163_v5 }
  0xf3   :  { %2008 = vmatpush2.bf16.msra.mxu0 %v5113_v62 }
  0xf4   :  { %2009 = vmatprep.subr.bf16.mxu0 %v5118_v0 }
  0xf5   :  { %2049 = vmatpush2.bf16.msra.mxu1 %v5161_v7 }
  0xf6   :  { %2050 = vmatprep.subr.bf16.mxu1 %v5166_v11 }
  0xf7   :  { %2010 = vmatpush2.bf16.msra.mxu0 %v5116_v2 }
  0xf8   :  { %2011 = vmatprep.subr.bf16.mxu0 %v5121_v4 }
  0xf9   :  { %2051 = vmatpush2.bf16.msra.mxu1 %v5164_v13 }
  0xfa   :  { %2052 = vmatprep.subr.bf16.mxu1 %v5169_v25 }
  0xfb   :  { %2012 = vmatpush2.bf16.msra.mxu0 %v5119_v6 }
  0xfc   :  { %2013 = vmatprep.subr.bf16.mxu0 %v5124_v10 }
  0xfd   :  { %2053 = vmatpush2.bf16.msra.mxu1 %v5167_v26 }
  0xfe   :  { %2054 = vmatprep.subr.bf16.mxu1 %v5172_v9 }
  0xff   :  { %2014 = vmatpush2.bf16.msra.mxu0 %v5122_v12 }
 0x100   :  { %2015 = vmatprep.subr.bf16.mxu0 %v5127_v14 }
 0x101   :  { %2055 = vmatpush2.bf16.msra.mxu1 %v5170_v31 }
 0x102   :  { %v1289_v21 = vpop.f32.mrf.mxu0  ;;  %2056 = vmatprep.subr.bf16.mxu1 %v5175_v19 }
 0x103   :  { %v1330_v22 = vpop.f32.mrf.mxu1  ;;  %2016 = vmatpush2.bf16.msra.mxu0 %v5125_v15 }
 0x104   :  { %v1291_v23 = vpop.f32.mrf.mxu0  ;;  %2017 = vmatprep.subr.bf16.mxu0 %v5130_v17 }
 0x105   :  { %v1332_v24 = vpop.f32.mrf.mxu1 }
 0x106   :  { %v1293_v27 = vpop.f32.mrf.mxu0 }
 0x107   :  { %v1334_v28 = vpop.f32.mrf.mxu1  ;;  %2018 = vmatpush2.bf16.msra.mxu0 %v5128_v18 }
 0x108   :  { %v1294_v29 = vpop.f32.mrf.mxu0 }
 0x109   :  { %v1335_v30 = vpop.f32.mrf.mxu1 }
 0x10b   :  { %v1412_v32 = vpop.f32.mrf.mxu1 }
 0x10d   :  { %v1414_v52 = vpop.f32.mrf.mxu1 }
 0x10f   :  { %v1416_v33 = vpop.f32.mrf.mxu1 }
 0x110   :  { %17 = vsyncpa [#allocation3], 0  ;;  %2057 = vmatpush2.bf16.msra.mxu1 %v5173_v20  ;;  %v5178_v35 = vld [vmem:[%s7358_s4 + $0x184] ss:$8 sps:$4 sm:$0xff]   ;;  %v5176_v8 = vld [vmem:[%s7358_s4 + $0x180] ss:$8 sps:$4 sm:$0xff]   ;;  %v251_v37 = vlaneseq }
 0x111   :  { %v1417_v34 = vpop.f32.mrf.mxu1  ;;  %2058 = vmatprep.subr.bf16.mxu1 %v5178_v35  ;;  %v249_v39 = vld [vmem:[%s7357_s3] sm:$0xf]  ;;  %v5182_v19 = vld [vmem:[%s7360_s6 + $0xe8] ss:$16 sps:$4 sm:$0xff]   ;;  %v5184_v20 = vld [vmem:[%s7360_s6 + $0xec] ss:$16 sps:$4 sm:$0xff]  }
 0x112   :  { %v6492_v38 = vshrl.u32 %v251_v37, 7  ;;  %v5187_v33 = vld [vmem:[%s7360_s6 + $0xc4] ss:$16 sps:$4 sm:$0xff]   ;;  %v5190_v34 = vld [vmem:[%s7360_s6 + $0xcc] ss:$16 sps:$4 sm:$0xff]  }
 0x113   :  { %v5185_v35 = vld [vmem:[%s7360_s6 + $0xc0] ss:$16 sps:$4 sm:$0xff]   ;;  %v5193_v37 = vld [vmem:[%s7360_s6 + $0xa4] ss:$16 sps:$4 sm:$0xff]  }
 0x114   :  { %2059 = vmatpush2.bf16.msra.mxu1 %v5176_v8  ;;  %v6495_v36 = vsub.s32 0, %v6492_v38  ;;  %v6501_v40 = vsub.s32 1, %v6492_v38  ;;  %v6507_v0 = vsub.s32 2, %v6492_v38  ;;  %v6510_v1 = vsub.s32 3, %v6492_v38  ;;  %v5188_v8 = vld [vmem:[%s7360_s6 + $0xc8] ss:$16 sps:$4 sm:$0xff]  }
 0x115   :  { %2331 = vmatprep.subr.bf16.mxu1 %v5184_v20  ;;  %v5242_v20 = vld [vmem:[%s7362_s8 + $0x498] ss:$28 sps:$4 sm:$0xff]  }
 0x116   :  { %v254_v41 = vrot.slane %v249_v39, %v6495_v36  ;;  %v258_v42 = vrot.slane %v249_v39, %v6501_v40  ;;  %v262_v3 = vrot.slane %v249_v39, %v6507_v0  ;;  %v266_v5 = vrot.slane %v249_v39, %v6510_v1  ;;  %v5196_v39 = vld [vmem:[%s7360_s6 + $0xac] ss:$16 sps:$4 sm:$0xff]  }
 0x118   :  { %v1290_v43 = vadd.f32 %v1289_v21, %v254_v41  ;;  %v1292_v44 = vadd.f32 %v1291_v23, %v258_v42  ;;  %v5191_v41 = vld [vmem:[%s7360_s6 + $0xa0] ss:$16 sps:$4 sm:$0xff]   ;;  %v5194_v42 = vld [vmem:[%s7360_s6 + $0xa8] ss:$16 sps:$4 sm:$0xff]  }
 0x11a   :  { %v1331_v45 = vadd.f32 %v1330_v22, %v1290_v43  ;;  %v1333_v47 = vadd.f32 %v1332_v24, %v1292_v44  ;;  %v5199_v43 = vld [vmem:[%s7360_s6 + $0x84] ss:$16 sps:$4 sm:$0xff]   ;;  %v5197_v44 = vld [vmem:[%s7360_s6 + $0x80] ss:$16 sps:$4 sm:$0xff]  }
 0x142   :  { %v1371_v46 = vpop.f32.mrf.mxu0 }
 0x143   :  { %v1372_v48 = vadd.f32 %v1371_v46, %v1331_v45  ;;  %v5200_v45 = vld [vmem:[%s7360_s6 + $0x88] ss:$16 sps:$4 sm:$0xff]   ;;  %v5205_v46 = vld [vmem:[%s7360_s6 + $0x64] ss:$16 sps:$4 sm:$0xff]  }
 0x144   :  { %v1373_v49 = vpop.f32.mrf.mxu0 }
 0x145   :  { %v1413_v50 = vadd.f32 %v1412_v32, %v1372_v48  ;;  %v1374_v51 = vadd.f32 %v1373_v49, %v1333_v47  ;;  %v5179_v32 = vld [vmem:[%s7360_s6 + $0xe0] ss:$16 sps:$4 sm:$0xff]   ;;  %v5208_v47 = vld [vmem:[%s7360_s6 + $0x6c] ss:$16 sps:$4 sm:$0xff]   ;;  %v5206_v49 = vld [vmem:[%s7360_s6 + $0x68] ss:$16 sps:$4 sm:$0xff]  }
 0x146   :  { %v1375_v53 = vpop.f32.mrf.mxu0  ;;  %v5203_v48 = vld [vmem:[%s7360_s6 + $0x60] ss:$16 sps:$4 sm:$0xff]  }
 0x147   :  { %v1415_v54 = vadd.f32 %v1414_v52, %v1374_v51  ;;  %v1583_v55 = vmax.f32 %v1413_v50, 0.0  ;;  %v5181_v52 = vld [vmem:[%s7360_s6 + $0xe4] ss:$16 sps:$4 sm:$0xff]   ;;  %v5214_v51 = vld [vmem:[%s7360_s6 + $0x4c] ss:$16 sps:$4 sm:$0xff]  }
 0x148   :  { %v1376_v56 = vpop.f32.mrf.mxu0  ;;  %2290 = vmatprep.subr.bf16.mxu0 %v5181_v52  ;;  %v5211_v50 = vld [vmem:[%s7360_s6 + $0x44] ss:$16 sps:$4 sm:$0xff]   ;;  %v5209_v53 = vld [vmem:[%s7360_s6 + $0x40] ss:$16 sps:$4 sm:$0xff]   ;;  %v5244_v52 = vld [vmem:[%s7362_s8 + $0x49c] ss:$28 sps:$4 sm:$0xff]  }
 0x149   :  { %v1584_v57 = vmax.f32 %v1415_v54, 0.0  ;;  %v1587_v60 = vpack.c.bf16 %v1583_v55, %v1583_v55  ;;  %v5212_v54 = vld [vmem:[%s7360_s6 + $0x48] ss:$16 sps:$4 sm:$0xff]   ;;  %v5217_v55 = vld [vmem:[%s7360_s6 + $0x24] ss:$16 sps:$4 sm:$0xff]  }
 0x14a   :  { %v5220_v56 = vld [vmem:[%s7360_s6 + $0x2c] ss:$16 sps:$4 sm:$0xff]  }
 0x14b   :  { %v1453_v58 = vpop.f32.mrf.mxu1  ;;  %v1588_v59 = vpack.c.bf16 %v1584_v57, %v1584_v57  ;;  %v5215_v57 = vld [vmem:[%s7360_s6 + $0x20] ss:$16 sps:$4 sm:$0xff]  }
 0x14c   :  { %v1454_v7 = vadd.f32 %v1453_v58, %v262_v3  ;;  %v5218_v58 = vld [vmem:[%s7360_s6 + $0x28] ss:$16 sps:$4 sm:$0xff]  }
 0x14d   :  { %v1455_v61 = vpop.f32.mrf.mxu1  ;;  %2019 = vmatprep.mubr.bf16.mxu0 %v1588_v59  ;;  %v5223_v59 = vld [vmem:[%s7360_s6 + $0x4] ss:$16 sps:$4 sm:$0xff]  }
 0x14e   :  { %2020 = vmatmul.mubr.bf16.vlgmr.msra.gmra.mxu0 %v1587_v60  ;;  %v1456_v11 = vadd.f32 %v1455_v61, %v266_v5  ;;  %v5226_v60 = vld [vmem:[%s7360_s6 + $0xc] ss:$16 sps:$4 sm:$0xff]   ;;  %v5221_v61 = vld [vmem:[%s7360_s6] ss:$16 sps:$4 sm:$0xff]  }
 0x14f   :  { %v1457_v62 = vpop.f32.mrf.mxu1  ;;  %2322 = vmatprep.mubr.bf16.mxu0 %v5597_v16  ;;  %2291 = vmatpush1.bf16.msra.mxu0 %v5179_v32  ;;  %v5241_v32 = vld [vmem:[%s7362_s8 + $0x11c] ss:$28 sps:$4 sm:$0xff]  }
 0x150   :  { %2292 = vmatprep.subr.bf16.mxu0 %v5187_v33  ;;  %v5224_v62 = vld [vmem:[%s7360_s6 + $0x8] ss:$16 sps:$4 sm:$0xff]   ;;  %v5247_v33 = vld [vmem:[%s7362_s8 + $0xe4] ss:$28 sps:$4 sm:$0xff]  }
 0x151   :  { %v1458_v63 = vpop.f32.mrf.mxu1 }
 0x152   :  { %v5229_v63 = vld [vmem:[%s7362_s8 + $0x18c] ss:$28 sps:$4 sm:$0xff]  }
 0x153   :  { %2293 = vmatpush1.bf16.msra.mxu0 %v5185_v35  ;;  %v5245_v35 = vld [vmem:[%s7362_s8 + $0xe0] ss:$28 sps:$4 sm:$0xff]  }
 0x154   :  { %2294 = vmatprep.subr.bf16.mxu0 %v5193_v37  ;;  %v5253_v37 = vld [vmem:[%s7362_s8 + $0xac] ss:$28 sps:$4 sm:$0xff]  }
 0x157   :  { %2295 = vmatpush1.bf16.msra.mxu0 %v5191_v41  ;;  %v5251_v41 = vld [vmem:[%s7362_s8 + $0xa8] ss:$28 sps:$4 sm:$0xff]  }
 0x158   :  { %2296 = vmatprep.subr.bf16.mxu0 %v5199_v43  ;;  %v5259_v43 = vld [vmem:[%s7362_s8 + $0x74] ss:$28 sps:$4 sm:$0xff]  }
 0x15b   :  { %2297 = vmatpush1.bf16.msra.mxu0 %v5197_v44  ;;  %v5257_v44 = vld [vmem:[%s7362_s8 + $0x70] ss:$28 sps:$4 sm:$0xff]  }
 0x15c   :  { %2298 = vmatprep.subr.bf16.mxu0 %v5205_v46  ;;  %v5265_v46 = vld [vmem:[%s7362_s8 + $0x3c] ss:$28 sps:$4 sm:$0xff]  }
 0x15f   :  { %2299 = vmatpush1.bf16.msra.mxu0 %v5203_v48  ;;  %v5263_v48 = vld [vmem:[%s7362_s8 + $0x38] ss:$28 sps:$4 sm:$0xff]  }
 0x160   :  { %2300 = vmatprep.subr.bf16.mxu0 %v5211_v50  ;;  %v5271_v50 = vld [vmem:[%s7362_s8 + $0x4] ss:$28 sps:$4 sm:$0xff]  }
 0x163   :  { %2301 = vmatpush1.bf16.msra.mxu0 %v5209_v53  ;;  %v5269_v53 = vld [vmem:[%s7362_s8] ss:$28 sps:$4 sm:$0xff]  }
 0x164   :  { %2302 = vmatprep.subr.bf16.mxu0 %v5217_v55  ;;  %v5277_v55 = vld [vmem:[%s7362_s8 + $0x34c] ss:$28 sps:$4 sm:$0xff]  }
 0x167   :  { %2303 = vmatpush1.bf16.msra.mxu0 %v5215_v57  ;;  %v5275_v57 = vld [vmem:[%s7362_s8 + $0x348] ss:$28 sps:$4 sm:$0xff]  }
 0x168   :  { %2304 = vmatprep.subr.bf16.mxu0 %v5223_v59  ;;  %v5283_v59 = vld [vmem:[%s7362_s8 + $0x314] ss:$28 sps:$4 sm:$0xff]  }
 0x16b   :  { %2305 = vmatpush1.bf16.msra.mxu0 %v5221_v61  ;;  %v5281_v61 = vld [vmem:[%s7362_s8 + $0x310] ss:$28 sps:$4 sm:$0xff]  }
 0x16c   :  { %3825 = vmatprep.subr.bf16.mxu0 %v5229_v63  ;;  %v5289_v63 = vld [vmem:[%s7362_s8 + $0x2dc] ss:$28 sps:$4 sm:$0xff]  }
 0x182   :  { %v1494_v2 = vpop.f32.mrf.mxu0 }
 0x183   :  { %v1495_v12 = vadd.f32 %v1494_v2, %v1454_v7  ;;  %v5232_v2 = vld [vmem:[%s7362_s8 + $0x50c] ss:$28 sps:$4 sm:$0xff]   ;;  %v1655_v7 = vld [vmem:[%s7359_s5] sm:$0x3] }
 0x184   :  { %v1496_v4 = vpop.f32.mrf.mxu0 }
 0x185   :  { %v1497_v15 = vadd.f32 %v1496_v4, %v1456_v11  ;;  %v1664_v11 = vrot.slane %v1655_v7, %v6501_v40 }
 0x186   :  { %v1498_v6 = vpop.f32.mrf.mxu0 }
 0x188   :  { %v1499_v10 = vpop.f32.mrf.mxu0 }
 0x189   :  { %v1660_v10 = vrot.slane %v1655_v7, %v6495_v36  ;;  %v5293_v7 = vld [vmem:[%s7362_s8 + $0x2a0] ss:$28 sps:$4 sm:$0xff]  }
 0x18a   :  { %v1576_v14 = vpop.f32.mrf.mxu0 }
 0x18b   :  { %v1535_v13 = vpop.f32.mrf.mxu1 }
 0x18c   :  { %v1536_v17 = vadd.f32 %v1535_v13, %v1495_v12  ;;  %v1578_v21 = vpop.f32.mrf.mxu0 }
 0x18d   :  { %v1537_v18 = vpop.f32.mrf.mxu1 }
 0x18e   :  { %v1577_v22 = vadd.f32 %v1576_v14, %v1536_v17  ;;  %v1538_v23 = vadd.f32 %v1537_v18, %v1497_v15  ;;  %v1580_v25 = vpop.f32.mrf.mxu0  ;;  %v2069_v18 = vld [vmem:[%s7355_s1] sm:$0xff] }
 0x18f   :  { %v1539_v24 = vpop.f32.mrf.mxu1 }
 0x190   :  { %v1579_v26 = vadd.f32 %v1578_v21, %v1538_v23  ;;  %v1585_v27 = vmax.f32 %v1577_v22, 0.0  ;;  %v1581_v29 = vpop.f32.mrf.mxu0 }
 0x191   :  { %v1540_v28 = vpop.f32.mrf.mxu1  ;;  %v5235_v29 = vld [vmem:[%s7362_s8 + $0x154] ss:$28 sps:$4 sm:$0xff]  }
 0x192   :  { %v1586_v30 = vmax.f32 %v1579_v26, 0.0  ;;  %v1589_v31 = vpack.c.bf16 %v1585_v27, %v1585_v27  ;;  %v5227_v26 = vld [vmem:[%s7362_s8 + $0x188] ss:$28 sps:$4 sm:$0xff]  }
 0x193   :  { %v5230_v27 = vld [vmem:[%s7362_s8 + $0x508] ss:$28 sps:$4 sm:$0xff]  }
 0x194   :  { %v1590_v9 = vpack.c.bf16 %v1586_v30, %v1586_v30  ;;  %v5238_v30 = vld [vmem:[%s7362_s8 + $0x4d4] ss:$28 sps:$4 sm:$0xff]  }
 0x196   :  { %2060 = vmatprep.mubr.bf16.mxu1 %v1590_v9  ;;  %v5233_v9 = vld [vmem:[%s7362_s8 + $0x150] ss:$28 sps:$4 sm:$0xff]  }
 0x197   :  { %2061 = vmatmul.mubr.bf16.vlgmr.msra.gmra.mxu1 %v1589_v31  ;;  %v5236_v31 = vld [vmem:[%s7362_s8 + $0x4d0] ss:$28 sps:$4 sm:$0xff]  }
 0x198   :  { %2332 = vmatpush1.bf16.msra.mxu1 %v5182_v19  ;;  %2363 = vmatprep.mubr.bf16.mxu1 %v5597_v16  ;;  %v5202_v16 = vld [vmem:[%s7360_s6 + $0x8c] ss:$16 sps:$4 sm:$0xff]   ;;  %v5239_v19 = vld [vmem:[%s7362_s8 + $0x118] ss:$28 sps:$4 sm:$0xff]  }
 0x199   :  { %2333 = vmatprep.subr.bf16.mxu1 %v5190_v34  ;;  %v5250_v34 = vld [vmem:[%s7362_s8 + $0x464] ss:$28 sps:$4 sm:$0xff]  }
 0x19c   :  { %2334 = vmatpush1.bf16.msra.mxu1 %v5188_v8  ;;  %v5248_v8 = vld [vmem:[%s7362_s8 + $0x460] ss:$28 sps:$4 sm:$0xff]  }
 0x19d   :  { %2335 = vmatprep.subr.bf16.mxu1 %v5196_v39  ;;  %v5256_v39 = vld [vmem:[%s7362_s8 + $0x42c] ss:$28 sps:$4 sm:$0xff]  }
 0x1a0   :  { %2336 = vmatpush1.bf16.msra.mxu1 %v5194_v42  ;;  %v5254_v42 = vld [vmem:[%s7362_s8 + $0x428] ss:$28 sps:$4 sm:$0xff]  }
 0x1a1   :  { %2337 = vmatprep.subr.bf16.mxu1 %v5202_v16  ;;  %v5262_v16 = vld [vmem:[%s7362_s8 + $0x3f4] ss:$28 sps:$4 sm:$0xff]  }
 0x1a4   :  { %2338 = vmatpush1.bf16.msra.mxu1 %v5200_v45  ;;  %v5260_v45 = vld [vmem:[%s7362_s8 + $0x3f0] ss:$28 sps:$4 sm:$0xff]  }
 0x1a5   :  { %2339 = vmatprep.subr.bf16.mxu1 %v5208_v47  ;;  %v5268_v47 = vld [vmem:[%s7362_s8 + $0x3bc] ss:$28 sps:$4 sm:$0xff]  }
 0x1a8   :  { %2340 = vmatpush1.bf16.msra.mxu1 %v5206_v49  ;;  %v5266_v49 = vld [vmem:[%s7362_s8 + $0x3b8] ss:$28 sps:$4 sm:$0xff]  }
 0x1a9   :  { %2341 = vmatprep.subr.bf16.mxu1 %v5214_v51  ;;  %v5274_v51 = vld [vmem:[%s7362_s8 + $0x384] ss:$28 sps:$4 sm:$0xff]  }
 0x1ac   :  { %2342 = vmatpush1.bf16.msra.mxu1 %v5212_v54  ;;  %v5272_v54 = vld [vmem:[%s7362_s8 + $0x380] ss:$28 sps:$4 sm:$0xff]  }
 0x1ad   :  { %2343 = vmatprep.subr.bf16.mxu1 %v5220_v56  ;;  %v5280_v56 = vld [vmem:[%s7362_s8 + $0x6cc] ss:$28 sps:$4 sm:$0xff]  }
 0x1b0   :  { %2344 = vmatpush1.bf16.msra.mxu1 %v5218_v58  ;;  %v5278_v58 = vld [vmem:[%s7362_s8 + $0x6c8] ss:$28 sps:$4 sm:$0xff]  }
 0x1b1   :  { %2345 = vmatprep.subr.bf16.mxu1 %v5226_v60  ;;  %v5286_v60 = vld [vmem:[%s7362_s8 + $0x694] ss:$28 sps:$4 sm:$0xff]  }
 0x1b4   :  { %2346 = vmatpush1.bf16.msra.mxu1 %v5224_v62  ;;  %v5284_v62 = vld [vmem:[%s7362_s8 + $0x690] ss:$28 sps:$4 sm:$0xff]  }
 0x1b5   :  { %3866 = vmatprep.subr.bf16.mxu1 %v5232_v2  ;;  %v5292_v2 = vld [vmem:[%s7362_s8 + $0x65c] ss:$28 sps:$4 sm:$0xff]  }
 0x20e   :  { %v2021_v3 = vpop.f32.mrf.mxu0 }
 0x20f   :  { %v2022_v12 = vadd.f32 %v2021_v3, %v1660_v10  ;;  %v5287_v3 = vld [vmem:[%s7362_s8 + $0x2d8] ss:$28 sps:$4 sm:$0xff]   ;;  %v5296_v10 = vld [vmem:[%s7362_s8 + $0x620] ss:$28 sps:$4 sm:$0xff]  }
 0x210   :  { %v2023_v4 = vpop.f32.mrf.mxu0 }
 0x211   :  { %v2024_v14 = vadd.f32 %v2023_v4, %v1664_v11  ;;  %v5290_v4 = vld [vmem:[%s7362_s8 + $0x658] ss:$28 sps:$4 sm:$0xff]   ;;  %v5301_v11 = vld [vmem:[%s7362_s8 + $0x26c] ss:$28 sps:$4 sm:$0xff]  }
 0x212   :  { %v2025_v5 = vpop.f32.mrf.mxu0 }
 0x213   :  { %v5295_v5 = vld [vmem:[%s7362_s8 + $0x2a4] ss:$28 sps:$4 sm:$0xff]  }
 0x214   :  { %v2026_v6 = vpop.f32.mrf.mxu0 }
 0x215   :  { %v5298_v6 = vld [vmem:[%s7362_s8 + $0x624] ss:$28 sps:$4 sm:$0xff]  }
 0x257   :  { %v2062_v13 = vpop.f32.mrf.mxu1 }
 0x258   :  { %v2063_v15 = vadd.f32 %v2062_v13, %v2022_v12  ;;  %v5304_v12 = vld [vmem:[%s7362_s8 + $0x5ec] ss:$28 sps:$4 sm:$0xff]  }
 0x259   :  { %v2064_v17 = vpop.f32.mrf.mxu1  ;;  %v5299_v13 = vld [vmem:[%s7362_s8 + $0x268] ss:$28 sps:$4 sm:$0xff]  }
 0x25a   :  { %2072 = vst [vmem:[%s7364_s10] sm:$0xff] %v2063_v15  ;;  %v2065_v21 = vadd.f32 %v2064_v17, %v2024_v14  ;;  %v5302_v14 = vld [vmem:[%s7362_s8 + $0x5e8] ss:$28 sps:$4 sm:$0xff]   ;;  %v5310_v17 = vld [vmem:[%s7362_s8 + $0x5b4] ss:$28 sps:$4 sm:$0xff]  }
 0x25b   :  { %v2066_v22 = vpop.f32.mrf.mxu1 }
 0x25c   :  { %v2070_v23 = vmul.f32 %v2069_v18, %v2065_v21  ;;  %2073 = vst [vmem:[%s7364_s10 + $0x8] sm:$0xff] %v2065_v21  ;;  %v5305_v18 = vld [vmem:[%s7362_s8 + $0x230] ss:$28 sps:$4 sm:$0xff]   ;;  %v5313_v22 = vld [vmem:[%s7362_s8 + $0x1fc] ss:$28 sps:$4 sm:$0xff]  }
 0x25d   :  { %v2067_v24 = vpop.f32.mrf.mxu1  ;;  %v5308_v21 = vld [vmem:[%s7362_s8 + $0x5b0] ss:$28 sps:$4 sm:$0xff]  }
 0x25e   :  { %v2071_v25 = vadd.f32 %v2070_v23, %v2063_v15  ;;  %v5307_v15 = vld [vmem:[%s7362_s8 + $0x234] ss:$28 sps:$4 sm:$0xff]   ;;  %v5316_v23 = vld [vmem:[%s7362_s8 + $0x57c] ss:$28 sps:$4 sm:$0xff]  }
 0x25f   :  { %v5311_v24 = vld [vmem:[%s7362_s8 + $0x1f8] ss:$28 sps:$4 sm:$0xff]  }
 0x260   :  { %2074 = vst [vmem:[%s7364_s10 + $0x10] sm:$0xff] %v2071_v25  ;;  %v2075_v28 = vpack.c.bf16 %v2071_v25, %v2071_v25  ;;  %v5314_v25 = vld [vmem:[%s7362_s8 + $0x578] ss:$28 sps:$4 sm:$0xff]  }
 0x262   :  { %2323 = vmatmul.mubr.bf16.vlgmr.msra.gmra.mxu0 %v2075_v28  ;;  %2364 = vmatmul.mubr.bf16.vlgmr.msra.gmra.mxu1 %v2075_v28  ;;  %v5317_v28 = vld [vmem:[%s7362_s8 + $0x1c0] ss:$28 sps:$4 sm:$0xff]  }
 0x263   :  { %3826 = vmatpush1.bf16.msra.mxu0 %v5227_v26  ;;  %3867 = vmatpush1.bf16.msra.mxu1 %v5230_v27  ;;  %v5319_v26 = vld [vmem:[%s7362_s8 + $0x1c4] ss:$28 sps:$4 sm:$0xff]  }
 0x264   :  { %3827 = vmatprep.subr.bf16.mxu0 %v5235_v29  ;;  %3868 = vmatprep.subr.bf16.mxu1 %v5238_v30  ;;  %v5322_v27 = vld [vmem:[%s7362_s8 + $0x544] ss:$28 sps:$4 sm:$0xff]   ;;  %v5325_v30 = vld [vmem:[%s7362_s8 + $0x194] ss:$28 sps:$4 sm:$0xff]  }
 0x265   :  { %v5320_v29 = vld [vmem:[%s7362_s8 + $0x540] ss:$28 sps:$4 sm:$0xff]  }
 0x267   :  { %3828 = vmatpush1.bf16.msra.mxu0 %v5233_v9  ;;  %3869 = vmatpush1.bf16.msra.mxu1 %v5236_v31  ;;  %v5328_v9 = vld [vmem:[%s7362_s8 + $0x514] ss:$28 sps:$4 sm:$0xff]   ;;  %v2108_v31 = vld [vmem:[%s7361_s7] sm:$0xf] }
 0x268   :  { %3829 = vmatprep.subr.bf16.mxu0 %v5241_v32  ;;  %3870 = vmatprep.subr.bf16.mxu1 %v5244_v52  ;;  %v2113_v32 = vrot.slane %v2108_v31, %v6495_v36  ;;  %v2121_v52 = vrot.slane %v2108_v31, %v6507_v0 }
 0x26b   :  { %3830 = vmatpush1.bf16.msra.mxu0 %v5239_v19  ;;  %3871 = vmatpush1.bf16.msra.mxu1 %v5242_v20  ;;  %v2117_v19 = vrot.slane %v2108_v31, %v6501_v40  ;;  %v2125_v20 = vrot.slane %v2108_v31, %v6510_v1  ;;  %v5379_v31 = vld [vmem:[%s7362_s8 + $0x31c] ss:$28 sps:$4 sm:$0xff]  }
 0x26c   :  { %3831 = vmatprep.subr.bf16.mxu0 %v5247_v33  ;;  %3872 = vmatprep.subr.bf16.mxu1 %v5250_v34 }
 0x26f   :  { %3832 = vmatpush1.bf16.msra.mxu0 %v5245_v35  ;;  %3873 = vmatpush1.bf16.msra.mxu1 %v5248_v8 }
 0x270   :  { %3833 = vmatprep.subr.bf16.mxu0 %v5253_v37  ;;  %3874 = vmatprep.subr.bf16.mxu1 %v5256_v39 }
 0x273   :  { %3834 = vmatpush1.bf16.msra.mxu0 %v5251_v41  ;;  %3875 = vmatpush1.bf16.msra.mxu1 %v5254_v42 }
 0x274   :  { %3835 = vmatprep.subr.bf16.mxu0 %v5259_v43  ;;  %3876 = vmatprep.subr.bf16.mxu1 %v5262_v16 }
 0x277   :  { %3836 = vmatpush1.bf16.msra.mxu0 %v5257_v44  ;;  %3877 = vmatpush1.bf16.msra.mxu1 %v5260_v45 }
 0x278   :  { %3837 = vmatprep.subr.bf16.mxu0 %v5265_v46  ;;  %3878 = vmatprep.subr.bf16.mxu1 %v5268_v47 }
 0x27b   :  { %3838 = vmatpush1.bf16.msra.mxu0 %v5263_v48  ;;  %3879 = vmatpush1.bf16.msra.mxu1 %v5266_v49 }
 0x27c   :  { %3839 = vmatprep.subr.bf16.mxu0 %v5271_v50  ;;  %3880 = vmatprep.subr.bf16.mxu1 %v5274_v51 }
 0x27f   :  { %3840 = vmatpush1.bf16.msra.mxu0 %v5269_v53  ;;  %3881 = vmatpush1.bf16.msra.mxu1 %v5272_v54  ;;  %v5323_v53 = vld [vmem:[%s7362_s8 + $0x190] ss:$28 sps:$4 sm:$0xff]  }
 0x280   :  { %3841 = vmatprep.subr.bf16.mxu0 %v5277_v55  ;;  %3882 = vmatprep.subr.bf16.mxu1 %v5280_v56  ;;  %v5326_v54 = vld [vmem:[%s7362_s8 + $0x510] ss:$28 sps:$4 sm:$0xff]  }
 0x283   :  { %3842 = vmatpush2.bf16.msra.mxu0 %v5275_v57  ;;  %3883 = vmatpush2.bf16.msra.mxu1 %v5278_v58  ;;  %v5331_v57 = vld [vmem:[%s7362_s8 + $0x15c] ss:$28 sps:$4 sm:$0xff]  }
 0x284   :  { %3843 = vmatprep.subr.bf16.mxu0 %v5283_v59  ;;  %3884 = vmatprep.subr.bf16.mxu1 %v5286_v60  ;;  %v5334_v58 = vld [vmem:[%s7362_s8 + $0x4dc] ss:$28 sps:$4 sm:$0xff]  }
 0x285   :  { %v5329_v59 = vld [vmem:[%s7362_s8 + $0x158] ss:$28 sps:$4 sm:$0xff]  }
 0x286   :  { %v5332_v60 = vld [vmem:[%s7362_s8 + $0x4d8] ss:$28 sps:$4 sm:$0xff]  }
 0x287   :  { %3844 = vmatpush2.bf16.msra.mxu0 %v5281_v61  ;;  %3885 = vmatpush2.bf16.msra.mxu1 %v5284_v62  ;;  %v5337_v61 = vld [vmem:[%s7362_s8 + $0x124] ss:$28 sps:$4 sm:$0xff]  }
 0x288   :  { %3845 = vmatprep.subr.bf16.mxu0 %v5289_v63  ;;  %3886 = vmatprep.subr.bf16.mxu1 %v5292_v2  ;;  %v5340_v62 = vld [vmem:[%s7362_s8 + $0x4a4] ss:$28 sps:$4 sm:$0xff]  }
 0x289   :  { %v5335_v63 = vld [vmem:[%s7362_s8 + $0x120] ss:$28 sps:$4 sm:$0xff]  }
 0x28a   :  { %v5338_v2 = vld [vmem:[%s7362_s8 + $0x4a0] ss:$28 sps:$4 sm:$0xff]  }
 0x28b   :  { %3846 = vmatpush2.bf16.msra.mxu0 %v5287_v3  ;;  %3887 = vmatpush2.bf16.msra.mxu1 %v5290_v4  ;;  %v5343_v3 = vld [vmem:[%s7362_s8 + $0xec] ss:$28 sps:$4 sm:$0xff]  }
 0x28c   :  { %3847 = vmatprep.subr.bf16.mxu0 %v5295_v5  ;;  %3888 = vmatprep.subr.bf16.mxu1 %v5298_v6  ;;  %v5346_v4 = vld [vmem:[%s7362_s8 + $0x46c] ss:$28 sps:$4 sm:$0xff]  }
 0x28d   :  { %v5341_v5 = vld [vmem:[%s7362_s8 + $0xe8] ss:$28 sps:$4 sm:$0xff]  }
 0x28e   :  { %v5344_v6 = vld [vmem:[%s7362_s8 + $0x468] ss:$28 sps:$4 sm:$0xff]  }
 0x28f   :  { %3848 = vmatpush2.bf16.msra.mxu0 %v5293_v7  ;;  %3889 = vmatpush2.bf16.msra.mxu1 %v5296_v10  ;;  %v5349_v7 = vld [vmem:[%s7362_s8 + $0xb4] ss:$28 sps:$4 sm:$0xff]  }
 0x290   :  { %3849 = vmatprep.subr.bf16.mxu0 %v5301_v11  ;;  %3890 = vmatprep.subr.bf16.mxu1 %v5304_v12  ;;  %v5352_v10 = vld [vmem:[%s7362_s8 + $0x434] ss:$28 sps:$4 sm:$0xff]  }
 0x291   :  { %v5347_v11 = vld [vmem:[%s7362_s8 + $0xb0] ss:$28 sps:$4 sm:$0xff]  }
 0x292   :  { %v5350_v12 = vld [vmem:[%s7362_s8 + $0x430] ss:$28 sps:$4 sm:$0xff]  }
 0x293   :  { %3850 = vmatpush2.bf16.msra.mxu0 %v5299_v13  ;;  %3891 = vmatpush2.bf16.msra.mxu1 %v5302_v14  ;;  %v5355_v13 = vld [vmem:[%s7362_s8 + $0x7c] ss:$28 sps:$4 sm:$0xff]  }
 0x294   :  { %3851 = vmatprep.subr.bf16.mxu0 %v5307_v15  ;;  %3892 = vmatprep.subr.bf16.mxu1 %v5310_v17  ;;  %v5358_v14 = vld [vmem:[%s7362_s8 + $0x3fc] ss:$28 sps:$4 sm:$0xff]  }
 0x295   :  { %v5353_v15 = vld [vmem:[%s7362_s8 + $0x78] ss:$28 sps:$4 sm:$0xff]  }
 0x296   :  { %v5356_v17 = vld [vmem:[%s7362_s8 + $0x3f8] ss:$28 sps:$4 sm:$0xff]  }
 0x297   :  { %3852 = vmatpush2.bf16.msra.mxu0 %v5305_v18  ;;  %3893 = vmatpush2.bf16.msra.mxu1 %v5308_v21  ;;  %v5361_v18 = vld [vmem:[%s7362_s8 + $0x44] ss:$28 sps:$4 sm:$0xff]  }
 0x298   :  { %3853 = vmatprep.subr.bf16.mxu0 %v5313_v22  ;;  %3894 = vmatprep.subr.bf16.mxu1 %v5316_v23  ;;  %v5364_v21 = vld [vmem:[%s7362_s8 + $0x3c4] ss:$28 sps:$4 sm:$0xff]  }
 0x299   :  { %v5359_v22 = vld [vmem:[%s7362_s8 + $0x40] ss:$28 sps:$4 sm:$0xff]  }
 0x29a   :  { %v5362_v23 = vld [vmem:[%s7362_s8 + $0x3c0] ss:$28 sps:$4 sm:$0xff]  }
 0x29b   :  { %3854 = vmatpush2.bf16.msra.mxu0 %v5311_v24  ;;  %3895 = vmatpush2.bf16.msra.mxu1 %v5314_v25  ;;  %v5367_v24 = vld [vmem:[%s7362_s8 + $0xc] ss:$28 sps:$4 sm:$0xff]  }
 0x29c   :  { %3855 = vmatprep.subr.bf16.mxu0 %v5319_v26  ;;  %3896 = vmatprep.subr.bf16.mxu1 %v5322_v27  ;;  %v5370_v25 = vld [vmem:[%s7362_s8 + $0x38c] ss:$28 sps:$4 sm:$0xff]  }
 0x29d   :  { %v5365_v26 = vld [vmem:[%s7362_s8 + $0x8] ss:$28 sps:$4 sm:$0xff]  }
 0x29e   :  { %v5368_v27 = vld [vmem:[%s7362_s8 + $0x388] ss:$28 sps:$4 sm:$0xff]  }
 0x29f   :  { %3856 = vmatpush2.bf16.msra.mxu0 %v5317_v28  ;;  %3897 = vmatpush2.bf16.msra.mxu1 %v5320_v29  ;;  %v5373_v28 = vld [vmem:[%s7362_s8 + $0x354] ss:$28 sps:$4 sm:$0xff]  }
 0x2a0   :  { %3907 = vmatprep.subr.bf16.mxu0 %v5325_v30  ;;  %3948 = vmatprep.subr.bf16.mxu1 %v5328_v9  ;;  %v5376_v29 = vld [vmem:[%s7362_s8 + $0x6d4] ss:$28 sps:$4 sm:$0xff]  }
 0x2a1   :  { %v5371_v30 = vld [vmem:[%s7362_s8 + $0x350] ss:$28 sps:$4 sm:$0xff]  }
 0x2a2   :  { %v5374_v9 = vld [vmem:[%s7362_s8 + $0x6d0] ss:$28 sps:$4 sm:$0xff]  }
 0x322   :  { %v2324_v33 = vpop.f32.mrf.mxu0  ;;  %v2365_v34 = vpop.f32.mrf.mxu1 }
 0x323   :  { %v2325_v35 = vadd.f32 %v2324_v33, %v2113_v32  ;;  %v2366_v8 = vadd.f32 %v2365_v34, %v2121_v52  ;;  %v5382_v32 = vld [vmem:[%s7362_s8 + $0x69c] ss:$28 sps:$4 sm:$0xff]   ;;  %v5388_v33 = vld [vmem:[%s7362_s8 + $0x664] ss:$28 sps:$4 sm:$0xff]  }
 0x324   :  { %v2326_v37 = vpop.f32.mrf.mxu0  ;;  %v2367_v39 = vpop.f32.mrf.mxu1  ;;  %v5377_v52 = vld [vmem:[%s7362_s8 + $0x318] ss:$28 sps:$4 sm:$0xff]   ;;  %v5383_v34 = vld [vmem:[%s7362_s8 + $0x2e0] ss:$28 sps:$4 sm:$0xff]  }
 0x325   :  { %v2327_v41 = vadd.f32 %v2326_v37, %v2117_v19  ;;  %v2368_v42 = vadd.f32 %v2367_v39, %v2125_v20  ;;  %v2372_v43 = vmax.f32 %v2325_v35, 0.0  ;;  %v2374_v16 = vmax.f32 %v2366_v8, 0.0  ;;  %v5380_v19 = vld [vmem:[%s7362_s8 + $0x698] ss:$28 sps:$4 sm:$0xff]   ;;  %v5385_v20 = vld [vmem:[%s7362_s8 + $0x2e4] ss:$28 sps:$4 sm:$0xff]  }
 0x326   :  { %v2328_v44 = vpop.f32.mrf.mxu0  ;;  %v2369_v45 = vpop.f32.mrf.mxu1  ;;  %v5386_v35 = vld [vmem:[%s7362_s8 + $0x660] ss:$28 sps:$4 sm:$0xff]   ;;  %v5391_v8 = vld [vmem:[%s7362_s8 + $0x2ac] ss:$28 sps:$4 sm:$0xff]  }
 0x327   :  { %v2373_v46 = vmax.f32 %v2327_v41, 0.0  ;;  %v2375_v47 = vmax.f32 %v2368_v42, 0.0  ;;  %v6843_v55 = vpack.c.bf16 %v2372_v43, %v2372_v43  ;;  %v6845_v56 = vpack.c.bf16 %v2374_v16, %v2374_v16  ;;  %v5394_v37 = vld [vmem:[%s7362_s8 + $0x62c] ss:$28 sps:$4 sm:$0xff]   ;;  %v5397_v42 = vld [vmem:[%s7362_s8 + $0x274] ss:$28 sps:$4 sm:$0xff]  }
 0x328   :  { %v2329_v48 = vpop.f32.mrf.mxu0  ;;  %v2370_v49 = vpop.f32.mrf.mxu1  ;;  %v5389_v39 = vld [vmem:[%s7362_s8 + $0x2a8] ss:$28 sps:$4 sm:$0xff]   ;;  %v5400_v43 = vld [vmem:[%s7362_s8 + $0x5f4] ss:$28 sps:$4 sm:$0xff]   ;;  %v5403_v45 = vld [vmem:[%s7362_s8 + $0x23c] ss:$28 sps:$4 sm:$0xff]  }
 0x329   :  { %v6833_v50 = vpack.c.bf16 %v2373_v46, %v2373_v46  ;;  %v6835_v51 = vpack.c.bf16 %v2375_v47, %v2375_v47  ;;  %v5392_v41 = vld [vmem:[%s7362_s8 + $0x628] ss:$28 sps:$4 sm:$0xff]   ;;  %v5395_v16 = vld [vmem:[%s7362_s8 + $0x270] ss:$28 sps:$4 sm:$0xff]   ;;  %v5406_v46 = vld [vmem:[%s7362_s8 + $0x5bc] ss:$28 sps:$4 sm:$0xff]  }
 0x32a   :  { %v5398_v44 = vld [vmem:[%s7362_s8 + $0x5f0] ss:$28 sps:$4 sm:$0xff]   ;;  %v5401_v47 = vld [vmem:[%s7362_s8 + $0x238] ss:$28 sps:$4 sm:$0xff]   ;;  %v5409_v49 = vld [vmem:[%s7362_s8 + $0x204] ss:$28 sps:$4 sm:$0xff]  }
 0x32b   :  { %3857 = vmatprep.mubr.bf16.mxu0 %v6833_v50  ;;  %3898 = vmatprep.mubr.bf16.mxu1 %v6835_v51  ;;  %v5404_v48 = vld [vmem:[%s7362_s8 + $0x5b8] ss:$28 sps:$4 sm:$0xff]  }
 0x32c   :  { %3858 = vmatmul.mubr.bf16.vlgmr.msra.gmra.mxu0 %v6843_v55  ;;  %3899 = vmatmul.mubr.bf16.vlgmr.msra.gmra.mxu1 %v6845_v56 }
 0x32d   :  { %3908 = vmatpush1.bf16.msra.mxu0 %v5323_v53  ;;  %3949 = vmatpush1.bf16.msra.mxu1 %v5326_v54  ;;  %v5412_v53 = vld [vmem:[%s7362_s8 + $0x584] ss:$28 sps:$4 sm:$0xff]  }
 0x32e   :  { %3939 = vmatprep.mubr.bf16.mxu0 %v6833_v50  ;;  %3980 = vmatprep.mubr.bf16.mxu1 %v6835_v51  ;;  %v5407_v54 = vld [vmem:[%s7362_s8 + $0x200] ss:$28 sps:$4 sm:$0xff]  }
 0x32f   :  { %3909 = vmatprep.subr.bf16.mxu0 %v5331_v57  ;;  %3950 = vmatprep.subr.bf16.mxu1 %v5334_v58  ;;  %v5410_v57 = vld [vmem:[%s7362_s8 + $0x580] ss:$28 sps:$4 sm:$0xff]   ;;  %v5415_v58 = vld [vmem:[%s7362_s8 + $0x1cc] ss:$28 sps:$4 sm:$0xff]  }
 0x331   :  { %3910 = vmatpush1.bf16.msra.mxu0 %v5329_v59  ;;  %3951 = vmatpush1.bf16.msra.mxu1 %v5332_v60  ;;  %v5418_v59 = vld [vmem:[%s7362_s8 + $0x54c] ss:$28 sps:$4 sm:$0xff]  }
 0x332   :  { %3911 = vmatprep.subr.bf16.mxu0 %v5337_v61  ;;  %3952 = vmatprep.subr.bf16.mxu1 %v5340_v62  ;;  %v5413_v60 = vld [vmem:[%s7362_s8 + $0x1c8] ss:$28 sps:$4 sm:$0xff]   ;;  %v5421_v62 = vld [vmem:[%s7362_s8 + $0x19c] ss:$28 sps:$4 sm:$0xff]  }
 0x333   :  { %v5416_v61 = vld [vmem:[%s7362_s8 + $0x548] ss:$28 sps:$4 sm:$0xff]  }
 0x335   :  { %3912 = vmatpush1.bf16.msra.mxu0 %v5335_v63  ;;  %3953 = vmatpush1.bf16.msra.mxu1 %v5338_v2  ;;  %v5424_v63 = vld [vmem:[%s7362_s8 + $0x51c] ss:$28 sps:$4 sm:$0xff]  }
 0x336   :  { %3913 = vmatprep.subr.bf16.mxu0 %v5343_v3  ;;  %3954 = vmatprep.subr.bf16.mxu1 %v5346_v4  ;;  %v5419_v2 = vld [vmem:[%s7362_s8 + $0x198] ss:$28 sps:$4 sm:$0xff]   ;;  %v5427_v4 = vld [vmem:[%s7362_s8 + $0x164] ss:$28 sps:$4 sm:$0xff]  }
 0x337   :  { %v5422_v3 = vld [vmem:[%s7362_s8 + $0x518] ss:$28 sps:$4 sm:$0xff]  }
 0x339   :  { %3914 = vmatpush1.bf16.msra.mxu0 %v5341_v5  ;;  %3955 = vmatpush1.bf16.msra.mxu1 %v5344_v6  ;;  %v5430_v5 = vld [vmem:[%s7362_s8 + $0x4e4] ss:$28 sps:$4 sm:$0xff]  }
 0x33a   :  { %3915 = vmatprep.subr.bf16.mxu0 %v5349_v7  ;;  %3956 = vmatprep.subr.bf16.mxu1 %v5352_v10  ;;  %v5425_v6 = vld [vmem:[%s7362_s8 + $0x160] ss:$28 sps:$4 sm:$0xff]   ;;  %v5433_v10 = vld [vmem:[%s7362_s8 + $0x12c] ss:$28 sps:$4 sm:$0xff]  }
 0x33b   :  { %v5428_v7 = vld [vmem:[%s7362_s8 + $0x4e0] ss:$28 sps:$4 sm:$0xff]  }
 0x33d   :  { %3916 = vmatpush1.bf16.msra.mxu0 %v5347_v11  ;;  %3957 = vmatpush1.bf16.msra.mxu1 %v5350_v12  ;;  %v5436_v11 = vld [vmem:[%s7362_s8 + $0x4ac] ss:$28 sps:$4 sm:$0xff]  }
 0x33e   :  { %3917 = vmatprep.subr.bf16.mxu0 %v5355_v13  ;;  %3958 = vmatprep.subr.bf16.mxu1 %v5358_v14  ;;  %v5431_v12 = vld [vmem:[%s7362_s8 + $0x128] ss:$28 sps:$4 sm:$0xff]   ;;  %v5439_v14 = vld [vmem:[%s7362_s8 + $0xf4] ss:$28 sps:$4 sm:$0xff]  }
 0x33f   :  { %v5434_v13 = vld [vmem:[%s7362_s8 + $0x4a8] ss:$28 sps:$4 sm:$0xff]  }
 0x341   :  { %3918 = vmatpush1.bf16.msra.mxu0 %v5353_v15  ;;  %3959 = vmatpush1.bf16.msra.mxu1 %v5356_v17  ;;  %v5442_v15 = vld [vmem:[%s7362_s8 + $0x474] ss:$28 sps:$4 sm:$0xff]  }
 0x342   :  { %3919 = vmatprep.subr.bf16.mxu0 %v5361_v18  ;;  %3960 = vmatprep.subr.bf16.mxu1 %v5364_v21  ;;  %v5437_v17 = vld [vmem:[%s7362_s8 + $0xf0] ss:$28 sps:$4 sm:$0xff]   ;;  %v5445_v21 = vld [vmem:[%s7362_s8 + $0xbc] ss:$28 sps:$4 sm:$0xff]  }
 0x343   :  { %v5440_v18 = vld [vmem:[%s7362_s8 + $0x470] ss:$28 sps:$4 sm:$0xff]  }
 0x345   :  { %3920 = vmatpush1.bf16.msra.mxu0 %v5359_v22  ;;  %3961 = vmatpush1.bf16.msra.mxu1 %v5362_v23  ;;  %v5448_v22 = vld [vmem:[%s7362_s8 + $0x43c] ss:$28 sps:$4 sm:$0xff]  }
 0x346   :  { %3921 = vmatprep.subr.bf16.mxu0 %v5367_v24  ;;  %3962 = vmatprep.subr.bf16.mxu1 %v5370_v25  ;;  %v5443_v23 = vld [vmem:[%s7362_s8 + $0xb8] ss:$28 sps:$4 sm:$0xff]   ;;  %v5451_v25 = vld [vmem:[%s7362_s8 + $0x84] ss:$28 sps:$4 sm:$0xff]  }
 0x347   :  { %v5446_v24 = vld [vmem:[%s7362_s8 + $0x438] ss:$28 sps:$4 sm:$0xff]  }
 0x349   :  { %3922 = vmatpush1.bf16.msra.mxu0 %v5365_v26  ;;  %3963 = vmatpush1.bf16.msra.mxu1 %v5368_v27  ;;  %v5454_v26 = vld [vmem:[%s7362_s8 + $0x404] ss:$28 sps:$4 sm:$0xff]  }
 0x34a   :  { %3923 = vmatprep.subr.bf16.mxu0 %v5373_v28  ;;  %3964 = vmatprep.subr.bf16.mxu1 %v5376_v29  ;;  %v5449_v27 = vld [vmem:[%s7362_s8 + $0x80] ss:$28 sps:$4 sm:$0xff]   ;;  %v5457_v29 = vld [vmem:[%s7362_s8 + $0x4c] ss:$28 sps:$4 sm:$0xff]  }
 0x34b   :  { %v5452_v28 = vld [vmem:[%s7362_s8 + $0x400] ss:$28 sps:$4 sm:$0xff]  }
 0x34d   :  { %3924 = vmatpush2.bf16.msra.mxu0 %v5371_v30  ;;  %3965 = vmatpush2.bf16.msra.mxu1 %v5374_v9  ;;  %v5460_v30 = vld [vmem:[%s7362_s8 + $0x3cc] ss:$28 sps:$4 sm:$0xff]  }
 0x34e   :  { %3925 = vmatprep.subr.bf16.mxu0 %v5379_v31  ;;  %3966 = vmatprep.subr.bf16.mxu1 %v5382_v32  ;;  %v5455_v9 = vld [vmem:[%s7362_s8 + $0x48] ss:$28 sps:$4 sm:$0xff]   ;;  %v5463_v32 = vld [vmem:[%s7362_s8 + $0x14] ss:$28 sps:$4 sm:$0xff]  }
 0x34f   :  { %v5458_v31 = vld [vmem:[%s7362_s8 + $0x3c8] ss:$28 sps:$4 sm:$0xff]  }
 0x351   :  { %3926 = vmatpush2.bf16.msra.mxu0 %v5377_v52  ;;  %3967 = vmatpush2.bf16.msra.mxu1 %v5380_v19  ;;  %v5466_v52 = vld [vmem:[%s7362_s8 + $0x394] ss:$28 sps:$4 sm:$0xff]  }
 0x352   :  { %3927 = vmatprep.subr.bf16.mxu0 %v5385_v20  ;;  %3968 = vmatprep.subr.bf16.mxu1 %v5388_v33  ;;  %v5461_v19 = vld [vmem:[%s7362_s8 + $0x10] ss:$28 sps:$4 sm:$0xff]   ;;  %v5469_v33 = vld [vmem:[%s7362_s8 + $0x35c] ss:$28 sps:$4 sm:$0xff]  }
 0x353   :  { %v5464_v20 = vld [vmem:[%s7362_s8 + $0x390] ss:$28 sps:$4 sm:$0xff]  }
 0x355   :  { %3928 = vmatpush2.bf16.msra.mxu0 %v5383_v34  ;;  %3969 = vmatpush2.bf16.msra.mxu1 %v5386_v35  ;;  %v5472_v34 = vld [vmem:[%s7362_s8 + $0x6dc] ss:$28 sps:$4 sm:$0xff]  }
 0x356   :  { %3929 = vmatprep.subr.bf16.mxu0 %v5391_v8  ;;  %3970 = vmatprep.subr.bf16.mxu1 %v5394_v37  ;;  %v5467_v35 = vld [vmem:[%s7362_s8 + $0x358] ss:$28 sps:$4 sm:$0xff]   ;;  %v5475_v37 = vld [vmem:[%s7362_s8 + $0x324] ss:$28 sps:$4 sm:$0xff]  }
 0x357   :  { %v5470_v8 = vld [vmem:[%s7362_s8 + $0x6d8] ss:$28 sps:$4 sm:$0xff]  }
 0x359   :  { %3930 = vmatpush2.bf16.msra.mxu0 %v5389_v39  ;;  %3971 = vmatpush2.bf16.msra.mxu1 %v5392_v41  ;;  %v5478_v39 = vld [vmem:[%s7362_s8 + $0x6a4] ss:$28 sps:$4 sm:$0xff]  }
 0x35a   :  { %3931 = vmatprep.subr.bf16.mxu0 %v5397_v42  ;;  %3972 = vmatprep.subr.bf16.mxu1 %v5400_v43  ;;  %v5473_v41 = vld [vmem:[%s7362_s8 + $0x320] ss:$28 sps:$4 sm:$0xff]   ;;  %v5481_v43 = vld [vmem:[%s7362_s8 + $0x2ec] ss:$28 sps:$4 sm:$0xff]  }
 0x35b   :  { %v5476_v42 = vld [vmem:[%s7362_s8 + $0x6a0] ss:$28 sps:$4 sm:$0xff]  }
 0x35d   :  { %3932 = vmatpush2.bf16.msra.mxu0 %v5395_v16  ;;  %3973 = vmatpush2.bf16.msra.mxu1 %v5398_v44  ;;  %v5484_v16 = vld [vmem:[%s7362_s8 + $0x66c] ss:$28 sps:$4 sm:$0xff]  }
 0x35e   :  { %3933 = vmatprep.subr.bf16.mxu0 %v5403_v45  ;;  %3974 = vmatprep.subr.bf16.mxu1 %v5406_v46  ;;  %v5479_v44 = vld [vmem:[%s7362_s8 + $0x2e8] ss:$28 sps:$4 sm:$0xff]   ;;  %v5487_v46 = vld [vmem:[%s7362_s8 + $0x2b4] ss:$28 sps:$4 sm:$0xff]  }
 0x35f   :  { %v5482_v45 = vld [vmem:[%s7362_s8 + $0x668] ss:$28 sps:$4 sm:$0xff]  }
 0x361   :  { %3934 = vmatpush2.bf16.msra.mxu0 %v5401_v47  ;;  %3975 = vmatpush2.bf16.msra.mxu1 %v5404_v48  ;;  %v5490_v47 = vld [vmem:[%s7362_s8 + $0x634] ss:$28 sps:$4 sm:$0xff]  }
 0x362   :  { %3935 = vmatprep.subr.bf16.mxu0 %v5409_v49  ;;  %3976 = vmatprep.subr.bf16.mxu1 %v5412_v53  ;;  %v5485_v48 = vld [vmem:[%s7362_s8 + $0x2b0] ss:$28 sps:$4 sm:$0xff]   ;;  %v5493_v53 = vld [vmem:[%s7362_s8 + $0x27c] ss:$28 sps:$4 sm:$0xff]  }
 0x363   :  { %v5488_v49 = vld [vmem:[%s7362_s8 + $0x630] ss:$28 sps:$4 sm:$0xff]  }
 0x365   :  { %3936 = vmatpush2.bf16.msra.mxu0 %v5407_v54  ;;  %3977 = vmatpush2.bf16.msra.mxu1 %v5410_v57  ;;  %v5496_v54 = vld [vmem:[%s7362_s8 + $0x5fc] ss:$28 sps:$4 sm:$0xff]  }
 0x366   :  { %3937 = vmatprep.subr.bf16.mxu0 %v5415_v58  ;;  %3978 = vmatprep.subr.bf16.mxu1 %v5418_v59  ;;  %v5491_v57 = vld [vmem:[%s7362_s8 + $0x278] ss:$28 sps:$4 sm:$0xff]   ;;  %v5499_v59 = vld [vmem:[%s7362_s8 + $0x244] ss:$28 sps:$4 sm:$0xff]  }
 0x367   :  { %v5494_v58 = vld [vmem:[%s7362_s8 + $0x5f8] ss:$28 sps:$4 sm:$0xff]  }
 0x369   :  { %3938 = vmatpush2.bf16.msra.mxu0 %v5413_v60  ;;  %3979 = vmatpush2.bf16.msra.mxu1 %v5416_v61  ;;  %v5502_v60 = vld [vmem:[%s7362_s8 + $0x5c4] ss:$28 sps:$4 sm:$0xff]  }
 0x36a   :  { %3989 = vmatprep.subr.bf16.mxu0 %v5421_v62  ;;  %4030 = vmatprep.subr.bf16.mxu1 %v5424_v63  ;;  %v5497_v61 = vld [vmem:[%s7362_s8 + $0x240] ss:$28 sps:$4 sm:$0xff]   ;;  %v5505_v63 = vld [vmem:[%s7362_s8 + $0x20c] ss:$28 sps:$4 sm:$0xff]  }
 0x36b   :  { %v5500_v62 = vld [vmem:[%s7362_s8 + $0x5c0] ss:$28 sps:$4 sm:$0xff]  }
 0x36c   :  { %3940 = vmatmul.mubr.bf16.vlgmr.msra.gmra.mxu0 %v6843_v55  ;;  %3981 = vmatmul.mubr.bf16.vlgmr.msra.gmra.mxu1 %v6845_v56 }
 0x36d   :  { %3990 = vmatpush1.bf16.msra.mxu0 %v5419_v2  ;;  %4021 = vmatprep.mubr.bf16.mxu0 %v6833_v50  ;;  %v5508_v2 = vld [vmem:[%s7362_s8 + $0x58c] ss:$28 sps:$4 sm:$0xff]  }
 0x36e   :  { %4031 = vmatpush1.bf16.msra.mxu1 %v5422_v3  ;;  %4062 = vmatprep.mubr.bf16.mxu1 %v6835_v51  ;;  %v5503_v3 = vld [vmem:[%s7362_s8 + $0x208] ss:$28 sps:$4 sm:$0xff]  }
 0x36f   :  { %3991 = vmatprep.subr.bf16.mxu0 %v5427_v4  ;;  %4032 = vmatprep.subr.bf16.mxu1 %v5430_v5  ;;  %v5506_v4 = vld [vmem:[%s7362_s8 + $0x588] ss:$28 sps:$4 sm:$0xff]   ;;  %v5511_v5 = vld [vmem:[%s7362_s8 + $0x1d4] ss:$28 sps:$4 sm:$0xff]  }
 0x371   :  { %3992 = vmatpush1.bf16.msra.mxu0 %v5425_v6  ;;  %v5514_v6 = vld [vmem:[%s7362_s8 + $0x554] ss:$28 sps:$4 sm:$0xff]  }
 0x372   :  { %4033 = vmatpush1.bf16.msra.mxu1 %v5428_v7  ;;  %3993 = vmatprep.subr.bf16.mxu0 %v5433_v10  ;;  %v5509_v7 = vld [vmem:[%s7362_s8 + $0x1d0] ss:$28 sps:$4 sm:$0xff]  }
 0x373   :  { %4034 = vmatprep.subr.bf16.mxu1 %v5436_v11  ;;  %v5512_v10 = vld [vmem:[%s7362_s8 + $0x550] ss:$28 sps:$4 sm:$0xff]   ;;  %v5515_v11 = vld [vmem:[%s7362_s8 + $0x360] ss:$28 sps:$4 sm:$0xff]  }
 0x375   :  { %3994 = vmatpush1.bf16.msra.mxu0 %v5431_v12  ;;  %v5516_v12 = vld [vmem:[%s7362_s8 + $0x6e0] ss:$28 sps:$4 sm:$0xff]  }
 0x376   :  { %4035 = vmatpush1.bf16.msra.mxu1 %v5434_v13  ;;  %3995 = vmatprep.subr.bf16.mxu0 %v5439_v14  ;;  %v5517_v13 = vld [vmem:[%s7362_s8 + $0x1a0] ss:$28 sps:$4 sm:$0xff]  }
 0x377   :  { %4036 = vmatprep.subr.bf16.mxu1 %v5442_v15  ;;  %v5518_v14 = vld [vmem:[%s7362_s8 + $0x520] ss:$28 sps:$4 sm:$0xff]   ;;  %v5519_v15 = vld [vmem:[%s7362_s8 + $0x328] ss:$28 sps:$4 sm:$0xff]  }
 0x379   :  { %3996 = vmatpush1.bf16.msra.mxu0 %v5437_v17  ;;  %v5520_v17 = vld [vmem:[%s7362_s8 + $0x6a8] ss:$28 sps:$4 sm:$0xff]  }
 0x37a   :  { %4037 = vmatpush1.bf16.msra.mxu1 %v5440_v18  ;;  %3997 = vmatprep.subr.bf16.mxu0 %v5445_v21  ;;  %v5521_v18 = vld [vmem:[%s7362_s8 + $0x168] ss:$28 sps:$4 sm:$0xff]  }
 0x37b   :  { %4038 = vmatprep.subr.bf16.mxu1 %v5448_v22  ;;  %v5522_v21 = vld [vmem:[%s7362_s8 + $0x4e8] ss:$28 sps:$4 sm:$0xff]   ;;  %v5523_v22 = vld [vmem:[%s7362_s8 + $0x2f0] ss:$28 sps:$4 sm:$0xff]  }
 0x37d   :  { %3998 = vmatpush1.bf16.msra.mxu0 %v5443_v23  ;;  %v5524_v23 = vld [vmem:[%s7362_s8 + $0x670] ss:$28 sps:$4 sm:$0xff]  }
 0x37e   :  { %4039 = vmatpush1.bf16.msra.mxu1 %v5446_v24  ;;  %3999 = vmatprep.subr.bf16.mxu0 %v5451_v25  ;;  %v5526_v24 = vld [vmem:[%s7362_s8 + $0x4b0] ss:$28 sps:$4 sm:$0xff]   ;;  %v5528_v25 = vld [vmem:[%s7362_s8 + $0x638] ss:$28 sps:$4 sm:$0xff]  }
 0x37f   :  { %4040 = vmatprep.subr.bf16.mxu1 %v5454_v26  ;;  %v5529_v26 = vld [vmem:[%s7362_s8 + $0xf8] ss:$28 sps:$4 sm:$0xff]  }
 0x381   :  { %4000 = vmatpush1.bf16.msra.mxu0 %v5449_v27  ;;  %v5530_v27 = vld [vmem:[%s7362_s8 + $0x478] ss:$28 sps:$4 sm:$0xff]  }
 0x382   :  { %4041 = vmatpush1.bf16.msra.mxu1 %v5452_v28  ;;  %4001 = vmatprep.subr.bf16.mxu0 %v5457_v29  ;;  %v5531_v28 = vld [vmem:[%s7362_s8 + $0x280] ss:$28 sps:$4 sm:$0xff]  }
 0x383   :  { %4042 = vmatprep.subr.bf16.mxu1 %v5460_v30  ;;  %v5532_v29 = vld [vmem:[%s7362_s8 + $0x600] ss:$28 sps:$4 sm:$0xff]  }
 0x384   :  { %v5533_v30 = vld [vmem:[%s7362_s8 + $0xc0] ss:$28 sps:$4 sm:$0xff]  }
 0x385   :  { %4002 = vmatpush1.bf16.msra.mxu0 %v5455_v9  ;;  %v5534_v9 = vld [vmem:[%s7362_s8 + $0x440] ss:$28 sps:$4 sm:$0xff]  }
 0x386   :  { %4043 = vmatpush1.bf16.msra.mxu1 %v5458_v31  ;;  %4003 = vmatprep.subr.bf16.mxu0 %v5463_v32  ;;  %v5535_v31 = vld [vmem:[%s7362_s8 + $0x248] ss:$28 sps:$4 sm:$0xff]  }
 0x387   :  { %4044 = vmatprep.subr.bf16.mxu1 %v5466_v52  ;;  %v5536_v32 = vld [vmem:[%s7362_s8 + $0x5c8] ss:$28 sps:$4 sm:$0xff]  }
 0x388   :  { %v5537_v52 = vld [vmem:[%s7362_s8 + $0x88] ss:$28 sps:$4 sm:$0xff]  }
 0x389   :  { %4004 = vmatpush1.bf16.msra.mxu0 %v5461_v19  ;;  %v5538_v19 = vld [vmem:[%s7362_s8 + $0x408] ss:$28 sps:$4 sm:$0xff]  }
 0x38a   :  { %4045 = vmatpush1.bf16.msra.mxu1 %v5464_v20  ;;  %4005 = vmatprep.subr.bf16.mxu0 %v5469_v33  ;;  %v5539_v20 = vld [vmem:[%s7362_s8 + $0x210] ss:$28 sps:$4 sm:$0xff]  }
 0x38b   :  { %4046 = vmatprep.subr.bf16.mxu1 %v5472_v34  ;;  %v5540_v33 = vld [vmem:[%s7362_s8 + $0x590] ss:$28 sps:$4 sm:$0xff]  }
 0x38c   :  { %v5541_v34 = vld [vmem:[%s7362_s8 + $0x50] ss:$28 sps:$4 sm:$0xff]  }
 0x38d   :  { %4006 = vmatpush2.bf16.msra.mxu0 %v5467_v35  ;;  %v5542_v35 = vld [vmem:[%s7362_s8 + $0x3d0] ss:$28 sps:$4 sm:$0xff]  }
 0x38e   :  { %4047 = vmatpush2.bf16.msra.mxu1 %v5470_v8  ;;  %4007 = vmatprep.subr.bf16.mxu0 %v5475_v37  ;;  %v5543_v8 = vld [vmem:[%s7362_s8 + $0x1d8] ss:$28 sps:$4 sm:$0xff]  }
 0x38f   :  { %4048 = vmatprep.subr.bf16.mxu1 %v5478_v39  ;;  %v5544_v37 = vld [vmem:[%s7362_s8 + $0x558] ss:$28 sps:$4 sm:$0xff]  }
 0x390   :  { %v5545_v39 = vld [vmem:[%s7362_s8 + $0x18] ss:$28 sps:$4 sm:$0xff]  }
 0x391   :  { %4008 = vmatpush2.bf16.msra.mxu0 %v5473_v41  ;;  %v5546_v41 = vld [vmem:[%s7362_s8 + $0x398] ss:$28 sps:$4 sm:$0xff]  }
 0x392   :  { %4049 = vmatpush2.bf16.msra.mxu1 %v5476_v42  ;;  %4009 = vmatprep.subr.bf16.mxu0 %v5481_v43  ;;  %v7334_v42 = vld [vmem:[%s7363_s9] sm:$0x7f] }
 0x393   :  { %4050 = vmatprep.subr.bf16.mxu1 %v5484_v16  ;;  %v2641_v43 = vrot.slane %v7334_v42, %v6495_v36  ;;  %v2645_v16 = vrot.slane %v7334_v42, %v6501_v40 }
 0x395   :  { %4010 = vmatpush2.bf16.msra.mxu0 %v5479_v44 }
 0x396   :  { %4051 = vmatpush2.bf16.msra.mxu1 %v5482_v45  ;;  %4011 = vmatprep.subr.bf16.mxu0 %v5487_v46 }
 0x397   :  { %4052 = vmatprep.subr.bf16.mxu1 %v5490_v47 }
 0x399   :  { %4012 = vmatpush2.bf16.msra.mxu0 %v5485_v48 }
 0x39a   :  { %4053 = vmatpush2.bf16.msra.mxu1 %v5488_v49  ;;  %4013 = vmatprep.subr.bf16.mxu0 %v5493_v53 }
 0x39b   :  { %4054 = vmatprep.subr.bf16.mxu1 %v5496_v54 }
 0x39d   :  { %4014 = vmatpush2.bf16.msra.mxu0 %v5491_v57 }
 0x39e   :  { %4055 = vmatpush2.bf16.msra.mxu1 %v5494_v58  ;;  %4015 = vmatprep.subr.bf16.mxu0 %v5499_v59 }
 0x39f   :  { %4056 = vmatprep.subr.bf16.mxu1 %v5502_v60 }
 0x3a1   :  { %4016 = vmatpush2.bf16.msra.mxu0 %v5497_v61 }
 0x3a2   :  { %4057 = vmatpush2.bf16.msra.mxu1 %v5500_v62  ;;  %4017 = vmatprep.subr.bf16.mxu0 %v5505_v63 }
 0x3a3   :  { %4058 = vmatprep.subr.bf16.mxu1 %v5508_v2 }
 0x3a5   :  { %4018 = vmatpush2.bf16.msra.mxu0 %v5503_v3  ;;  %v2649_v3 = vrot.slane %v7334_v42, %v6507_v0 }
 0x3a6   :  { %4059 = vmatpush2.bf16.msra.mxu1 %v5506_v4  ;;  %4019 = vmatprep.subr.bf16.mxu0 %v5511_v5  ;;  %v2653_v4 = vrot.slane %v7334_v42, %v6510_v1 }
 0x3a7   :  { %4060 = vmatprep.subr.bf16.mxu1 %v5514_v6 }
 0x3a9   :  { %4020 = vmatpush2.bf16.msra.mxu0 %v5509_v7 }
 0x3aa   :  { %4061 = vmatpush2.bf16.msra.mxu1 %v5512_v10  ;;  %4743 = vmatprep.subr.bf16.mxu0 %v5515_v11 }
 0x3ab   :  { %4765 = vmatprep.subr.bf16.mxu1 %v5516_v12 }
 0x3ac   :  { %4022 = vmatmul.mubr.bf16.vlgmr.msra.gmra.mxu0 %v6843_v55 }
 0x3ad   :  { %4063 = vmatmul.mubr.bf16.vlgmr.msra.gmra.mxu1 %v6845_v56  ;;  %4744 = vmatpush3.bf16.msra.mxu0 %v5517_v13 }
 0x3ae   :  { %4103 = vmatprep.mubr.bf16.mxu0 %v6833_v50  ;;  %4766 = vmatpush3.bf16.msra.mxu1 %v5518_v14  ;;  %v5525_v50 = vld [vmem:[%s7362_s8 + $0x130] ss:$28 sps:$4 sm:$0xff]  }
 0x3af   :  { %4143 = vmatprep.mubr.bf16.mxu1 %v6835_v51  ;;  %4745 = vmatprep.subr.bf16.mxu0 %v5519_v15  ;;  %v5527_v51 = vld [vmem:[%s7362_s8 + $0x2b8] ss:$28 sps:$4 sm:$0xff]   ;;  %s5598_s8 = smov [#allocation2]  }
 0x3b0   :  { %4767 = vmatprep.subr.bf16.mxu1 %v5520_v17  ;;  %s4208_s9 = sshll.u32 %s5598_s8, 4  ;;  %s4209_s9 = int_to_ptr.vmem [resolvable:$true] %s4208_s9 }
 0x3b1   :  { %4746 = vmatpush3.bf16.msra.mxu0 %v5521_v18  ;;  %s5575_s27 = scalar_lea.vmem %s4209_s9, 896  ;;  %p5580_p1 = scmp.lt.s32.totalorder %s4209_s9, %s4209_s9 }
 0x3b2   :  { %4768 = vmatpush3.bf16.msra.mxu1 %v5522_v21  ;;  %4747 = vmatprep.subr.bf16.mxu0 %v5523_v22  ;;  %p5576_p0 = scmp.ne.s32.totalorder %s4209_s9, %s5575_s27  ;;  %p5581_p2 = scmp.lt.s32.totalorder %s5575_s27, %s5575_s27 }
 0x3b3   :  { %4769 = vmatprep.subr.bf16.mxu1 %v5524_v23 }
 0x3b4   :  { %p5582_p3 = por %p5581_p2, %p5580_p1 }
 0x3b5   :  { %4748 = vmatpush3.bf16.msra.mxu0 %v5525_v50 }
 0x3b6   :  { %4770 = vmatpush3.bf16.msra.mxu1 %v5526_v24  ;;  %4749 = vmatprep.subr.bf16.mxu0 %v5527_v51  ;;  %p5583_p4 = pnand %p5582_p3, %p5576_p0 }
 0x3b7   :  { %4771 = vmatprep.subr.bf16.mxu1 %v5528_v25 }
 0x3b9   :  { %4750 = vmatpush3.bf16.msra.mxu0 %v5529_v26  ;;  %v2656_v26 = vsub.s32 4, %v6492_v38 }
 0x3ba   :  { %4772 = vmatpush3.bf16.msra.mxu1 %v5530_v27  ;;  %4751 = vmatprep.subr.bf16.mxu0 %v5531_v28  ;;  %v2660_v27 = vsub.s32 5, %v6492_v38 }
 0x3bb   :  { %4773 = vmatprep.subr.bf16.mxu1 %v5532_v29  ;;  %v2657_v28 = vrot.slane %v7334_v42, %v2656_v26 }
 0x3bc   :  { %v2661_v29 = vrot.slane %v7334_v42, %v2660_v27 }
 0x3bd   :  { %4752 = vmatpush3.bf16.msra.mxu0 %v5533_v30 }
 0x3be   :  { %4774 = vmatpush3.bf16.msra.mxu1 %v5534_v9  ;;  %4753 = vmatprep.subr.bf16.mxu0 %v5535_v31 }
 0x3bf   :  { %4775 = vmatprep.subr.bf16.mxu1 %v5536_v32 }
 0x3c1   :  { %4754 = vmatpush3.bf16.msra.mxu0 %v5537_v52 }
 0x3c2   :  { %4776 = vmatpush3.bf16.msra.mxu1 %v5538_v19  ;;  %4755 = vmatprep.subr.bf16.mxu0 %v5539_v20 }
 0x3c3   :  { %4777 = vmatprep.subr.bf16.mxu1 %v5540_v33 }
 0x3c5   :  { %4756 = vmatpush3.bf16.msra.mxu0 %v5541_v34 }
 0x3c6   :  { %4778 = vmatpush3.bf16.msra.mxu1 %v5542_v35  ;;  %4757 = vmatprep.subr.bf16.mxu0 %v5543_v8 }
 0x3c7   :  { %4779 = vmatprep.subr.bf16.mxu1 %v5544_v37 }
 0x3c9   :  { %4758 = vmatpush3.bf16.msra.mxu0 %v5545_v39 }
 0x3ca   :  { %4780 = vmatpush3.bf16.msra.mxu1 %v5546_v41 }
 0x3cc   :  { %4104 = vmatmul.mubr.bf16.vlgmr.msra.gmra.mxu0 %v6843_v55 }
 0x3cd   :  { %4144 = vmatmul.mubr.bf16.vlgmr.msra.gmra.mxu1 %v6845_v56 }
 0x3ec   :  { %v3859_v44 = vpop.f32.mrf.mxu0  ;;  %v3900_v45 = vpop.f32.mrf.mxu1 }
 0x3ed   :  { %v3860_v46 = vadd.f32 %v3859_v44, %v2641_v43 }
 0x3ee   :  { %v3861_v47 = vpop.f32.mrf.mxu0  ;;  %v3902_v48 = vpop.f32.mrf.mxu1 }
 0x3ef   :  { %v3901_v49 = vadd.f32 %v3900_v45, %v3860_v46  ;;  %v3862_v55 = vadd.f32 %v3861_v47, %v2645_v16  ;;  %v2664_v46 = vsub.s32 6, %v6492_v38 }
 0x3f0   :  { %v3863_v53 = vpop.f32.mrf.mxu0  ;;  %v3904_v56 = vpop.f32.mrf.mxu1 }
 0x3f1   :  { %v4736_v54 = vmul.f32 -1.442695, %v3901_v49  ;;  %v3903_v57 = vadd.f32 %v3902_v48, %v3862_v55  ;;  %v2665_v49 = vrot.slane %v7334_v42, %v2664_v46 }
 0x3f2   :  { %v3864_v58 = vpop.f32.mrf.mxu0  ;;  %v3905_v59 = vpop.f32.mrf.mxu1 }
 0x3f3   :  { %5547 = vpow2.f32 %v4736_v54  ;;  %v4737_v60 = vmul.f32 -1.442695, %v3903_v57 }
 0x3f5   :  { %5549 = vpow2.f32 %v4737_v60 }
 0x400   :  { %v5548_v36 = vpop.eup %5547 }
 0x401   :  { %v4172_v61 = vadd.f32 1.0, %v5548_v36 }
 0x402   :  { %v5550_v62 = vpop.eup %5549 }
 0x403   :  { %5551 = vrcp.f32 %v4172_v61  ;;  %v4173_v40 = vadd.f32 1.0, %v5550_v62 }
 0x405   :  { %5553 = vrcp.f32 %v4173_v40 }
 0x410   :  { %v5552_v63 = vpop.eup %5551 }
 0x411   :  { %4193 = vst [vmem:[#allocation2] sm:$0xff] %v5552_v63 }
 0x412   :  { %v5554_v2 = vpop.eup %5553 }
 0x413   :  { %4194 = vst [vmem:[#allocation2 + $0x8] sm:$0xff] %v5554_v2 }
 0x42c   :  { %v3941_v5 = vpop.f32.mrf.mxu0  ;;  %v3982_v6 = vpop.f32.mrf.mxu1 }
 0x42d   :  { %v3942_v7 = vadd.f32 %v3941_v5, %v2649_v3 }
 0x42e   :  { %v3943_v10 = vpop.f32.mrf.mxu0  ;;  %v3984_v11 = vpop.f32.mrf.mxu1 }
 0x42f   :  { %v3983_v12 = vadd.f32 %v3982_v6, %v3942_v7  ;;  %v3944_v13 = vadd.f32 %v3943_v10, %v2653_v4 }
 0x430   :  { %v3945_v14 = vpop.f32.mrf.mxu0  ;;  %v3986_v15 = vpop.f32.mrf.mxu1 }
 0x431   :  { %v4738_v17 = vmul.f32 -1.442695, %v3983_v12  ;;  %v3985_v18 = vadd.f32 %v3984_v11, %v3944_v13 }
 0x432   :  { %v3946_v21 = vpop.f32.mrf.mxu0  ;;  %v3987_v22 = vpop.f32.mrf.mxu1 }
 0x433   :  { %5555 = vpow2.f32 %v4738_v17  ;;  %v4739_v23 = vmul.f32 -1.442695, %v3985_v18 }
 0x435   :  { %5557 = vpow2.f32 %v4739_v23 }
 0x440   :  { %v5556_v0 = vpop.eup %5555 }
 0x441   :  { %v4174_v50 = vadd.f32 1.0, %v5556_v0 }
 0x442   :  { %v5558_v24 = vpop.eup %5557 }
 0x443   :  { %5559 = vrcp.f32 %v4174_v50  ;;  %v4175_v1 = vadd.f32 1.0, %v5558_v24 }
 0x445   :  { %5561 = vrcp.f32 %v4175_v1 }
 0x450   :  { %v5560_v51 = vpop.eup %5559 }
 0x451   :  { %4195 = vst [vmem:[#allocation2 + $0x10] sm:$0xff] %v5560_v51 }
 0x452   :  { %v5562_v25 = vpop.eup %5561 }
 0x453   :  { %4196 = vst [vmem:[#allocation2 + $0x18] sm:$0xff] %v5562_v25 }
 0x46c   :  { %v4023_v30 = vpop.f32.mrf.mxu0 }
 0x46d   :  { %v4024_v9 = vadd.f32 %v4023_v30, %v2657_v28  ;;  %v4064_v31 = vpop.f32.mrf.mxu1 }
 0x46e   :  { %v4025_v32 = vpop.f32.mrf.mxu0 }
 0x46f   :  { %v4065_v52 = vadd.f32 %v4064_v31, %v4024_v9  ;;  %v4026_v19 = vadd.f32 %v4025_v32, %v2661_v29  ;;  %v4066_v20 = vpop.f32.mrf.mxu1 }
 0x470   :  { %v4027_v33 = vpop.f32.mrf.mxu0 }
 0x471   :  { %v4740_v34 = vmul.f32 -1.442695, %v4065_v52  ;;  %v4067_v35 = vadd.f32 %v4066_v20, %v4026_v19  ;;  %v4068_v8 = vpop.f32.mrf.mxu1 }
 0x472   :  { %v4028_v37 = vpop.f32.mrf.mxu0 }
 0x473   :  { %5563 = vpow2.f32 %v4740_v34  ;;  %v4741_v39 = vmul.f32 -1.442695, %v4067_v35  ;;  %v4069_v41 = vpop.f32.mrf.mxu1 }
 0x475   :  { %5565 = vpow2.f32 %v4741_v39 }
 0x480   :  { %v5564_v43 = vpop.eup %5563 }
 0x481   :  { %v4176_v16 = vadd.f32 1.0, %v5564_v43 }
 0x482   :  { %v5566_v44 = vpop.eup %5565 }
 0x483   :  { %5567 = vrcp.f32 %v4176_v16  ;;  %v4177_v45 = vadd.f32 1.0, %v5566_v44 }
 0x485   :  { %5569 = vrcp.f32 %v4177_v45 }
 0x48c   :  { %v4759_v47 = vpop.f32.mrf.mxu0 }
 0x48d   :  { %v4781_v48 = vpop.f32.mrf.mxu1 }
 0x48e   :  { %v4760_v55 = vpop.f32.mrf.mxu0 }
 0x48f   :  { %v4761_v53 = vadd.f32 %v4760_v55, %v4759_v47  ;;  %v4782_v56 = vpop.f32.mrf.mxu1 }
 0x490   :  { %v5568_v54 = vpop.eup %5567  ;;  %v4762_v57 = vpop.f32.mrf.mxu0  ;;  %v4783_v59 = vadd.f32 %v4782_v56, %v4781_v48 }
 0x491   :  { %4197 = vst [vmem:[#allocation2 + $0x20] sm:$0xff] %v5568_v54  ;;  %v4106_v58 = vadd.f32 %v4761_v53, %v2665_v49  ;;  %v4784_v60 = vpop.f32.mrf.mxu1 }
 0x492   :  { %v5570_v36 = vpop.eup %5569  ;;  %v4763_v61 = vpop.f32.mrf.mxu0 }
 0x493   :  { %4198 = vst [vmem:[#allocation2 + $0x28] sm:$0xff] %v5570_v36  ;;  %v4146_v62 = vadd.f32 %v4783_v59, %v4106_v58  ;;  %v4785_v40 = vpop.f32.mrf.mxu1 }
 0x495   :  { %v4742_v63 = vmul.f32 -1.442695, %v4146_v62 }
 0x497   :  { %5571 = vpow2.f32 %v4742_v63 }
 0x4a4   :  { %v5572_v38 = vpop.eup %5571 }
 0x4a5   :  { %v4178_v2 = vadd.f32 1.0, %v5572_v38 }
 0x4a7   :  { %5573 = vrcp.f32 %v4178_v2 }
 0x4b4   :  { %v5574_v42 = vpop.eup %5573 }
 0x4b5   :  { %4199 = vst.msk [vmem:[#allocation2 + $0x30] sm:$0xff] %vm1251_vm0, %v5574_v42 }
 0x4b6   :  { %5586 = shalt.err (!%p5583_p4)
}
 0x4b7   :  { %4211 = dma.vmem_to_hbm [thread:$0]  %s4209_s9, 896, %s7365_s11, [#allocation3]  }
 0x4b8   :  { %5595 = dma.done.wait [#allocation3], 896  }
 0x4b9   :  { %5596 = vsyncadd [#allocation3], 4294966400 }
 0x4ba   :  { %4217 = vsyncpa [#allocation3], 1 }

</bundles_post_ra>
